<compile_context>
chip_gen: v7x
topology: tpu7x:2x2x1
jax: 0.10.0
libtpu: 0.0.40
codegen_flags: <defaults>
</compile_context>

<pallas_src>
import functools

import jax
import jax.numpy as jnp
from jax import lax
from jax.experimental import pallas as pl
from jax.experimental.pallas import tpu as pltpu

C_PAD = 128  # lane-dense output tile width; real classes sliced outside the kernel


def roberta_head_kernel(x_ref, w1t_ref, b1_ref, w2_ref, b2_ref, o_ref, acc_ref):
    # x_ref:   (B, TK)      slice of features along F
    # w1t_ref: (H, TK)      slice of dense.weight (PyTorch (out, in) layout) along F
    # b1_ref:  (1, H)       f32
    # w2_ref:  (H, C_PAD)   out_proj.weight transposed + lane-padded to 128
    # b2_ref:  (1, C_PAD)   f32
    # o_ref:   (B, C_PAD)   f32 logits (padded)
    # acc_ref: (B, H) f32   accumulator, resident across the K grid axis
    k = pl.program_id(0)

    @pl.when(k == 0)
    def _():
        acc_ref[...] = jnp.zeros_like(acc_ref)

    # (B, TK) . (H, TK) contracted over TK -> (B, H), f32 accumulation on the MXU.
    # W1 stays in its native (H, F) layout; no transpose of the big operand.
    acc_ref[...] += lax.dot_general(
        x_ref[...], w1t_ref[...],
        dimension_numbers=(((1,), (1,)), ((), ())),
        preferred_element_type=jnp.float32,
    )

    @pl.when(k == pl.num_programs(0) - 1)
    def _():
        h = jnp.tanh(acc_ref[...] + b1_ref[...])                      # (B, H) f32
        out = jnp.dot(h, w2_ref[...].astype(jnp.float32),
                      preferred_element_type=jnp.float32)             # (B, C_PAD)
        o_ref[...] = (out + b2_ref[...]).astype(o_ref.dtype)


def prepare_roberta_head_params(w_dense_t, b_dense, w_out_t, b_out,
                                *, weight_dtype=jnp.bfloat16):
    """One-time weight prep (hoisted out of the per-call path).

    w_dense_t: (H, F)  dense.weight in PyTorch (out_features, in_features) layout
    b_dense:   (H,)
    w_out_t:   (C, H)  out_proj.weight in PyTorch layout (C = 3)
    b_out:     (C,)
    """
    H, _ = w_dense_t.shape
    C = w_out_t.shape[0]
    w1 = w_dense_t.astype(weight_dtype)                    # keep (H, F): lane-dense over F
    b1 = b_dense.reshape(1, H).astype(jnp.float32)
    w2 = (jnp.zeros((H, C_PAD), weight_dtype)
          .at[:, :C].set(w_out_t.T.astype(weight_dtype)))  # zero-padded extra lanes
    b2 = (jnp.zeros((1, C_PAD), jnp.float32)
          .at[:, :C].set(b_out.astype(jnp.float32)))
    return w1, b1, w2, b2


@functools.partial(jax.jit, static_argnames=("num_classes", "block_k"))
def roberta_classification_head(features, w1, b1, w2, b2, *,
                                num_classes=3, block_k=None):
    """Inference-mode forward. features: (B, F); weights from prepare_roberta_head_params."""
    B, F = features.shape
    H = w1.shape[0]
    if block_k is None:
        block_k = F                       # single grid step: the op is HBM-bound,
                                          # extra steps only add fixed overhead
    assert F % block_k == 0 and block_k % 128 == 0
    k_tiles = F // block_k

    bytes_accessed = (features.size * features.dtype.itemsize
                      + w1.size * w1.dtype.itemsize
                      + w2.size * w2.dtype.itemsize
                      + (b1.size + b2.size + B * C_PAD) * 4)
    cost = pl.CostEstimate(
        flops=2 * B * H * F + 2 * B * H * C_PAD,
        transcendentals=B * H,
        bytes_accessed=bytes_accessed,
    )

    out_padded = pl.pallas_call(
        roberta_head_kernel,
        out_shape=jax.ShapeDtypeStruct((B, C_PAD), jnp.float32),  # f32 logits always
        grid=(k_tiles,),
        in_specs=[
            pl.BlockSpec((B, block_k), lambda k: (0, k)),   # features, streamed over F
            pl.BlockSpec((H, block_k), lambda k: (0, k)),   # W1 (H, F), streamed over F
            pl.BlockSpec((1, H), lambda k: (0, 0)),          # b1, resident
            pl.BlockSpec((H, C_PAD), lambda k: (0, 0)),      # W2 padded, resident
            pl.BlockSpec((1, C_PAD), lambda k: (0, 0)),      # b2 padded, resident
        ],
        out_specs=pl.BlockSpec((B, C_PAD), lambda k: (0, 0)),
        scratch_shapes=[pltpu.VMEM((B, H), jnp.float32)],
        compiler_params=pltpu.CompilerParams(
            dimension_semantics=("arbitrary",),  # reduction axis
        ),
        cost_estimate=cost,
    )(features, w1, b1, w2, b2)

    return out_padded[:, :num_classes]


if __name__ == "__main__":
    IN_FEATURES = 768 * 10 * 2   # = 15360, as hard-coded in the module
    HIDDEN = 32                  # config.hidden_size (small for the demo)
    NUM_CLASSES = 3
    BATCH = 2

    key = jax.random.PRNGKey(0)
    k_x, k_w1, k_b1, k_w2, k_b2 = jax.random.split(key, 5)

    features = jax.random.normal(k_x, (BATCH, IN_FEATURES), dtype=jnp.float32)

    # Deterministic "nn.Linear"-style init (uniform +/- 1/sqrt(fan_in)),
    # weights stored in PyTorch's (out_features, in_features) layout.
    lim1 = 1.0 / (IN_FEATURES ** 0.5)
    w_dense_t = jax.random.uniform(k_w1, (HIDDEN, IN_FEATURES), jnp.float32, -lim1, lim1)
    b_dense = jax.random.uniform(k_b1, (HIDDEN,), jnp.float32, -lim1, lim1)

    lim2 = 1.0 / (HIDDEN ** 0.5)
    w_out_t = jax.random.uniform(k_w2, (NUM_CLASSES, HIDDEN), jnp.float32, -lim2, lim2)
    b_out = jax.random.uniform(k_b2, (NUM_CLASSES,), jnp.float32, -lim2, lim2)

    # Pure-JAX reference (f32).
    ref = jnp.tanh(features @ w_dense_t.T + b_dense) @ w_out_t.T + b_out

    # ---- f32 weight path: exact-tolerance check, single K step ----
    p32 = prepare_roberta_head_params(w_dense_t, b_dense, w_out_t, b_out,
                                      weight_dtype=jnp.float32)
    out32 = roberta_classification_head(features, *p32, num_classes=NUM_CLASSES)
    out32 = jax.block_until_ready(out32)
    assert out32.shape == (BATCH, NUM_CLASSES)
    assert out32.dtype == jnp.float32
    assert jnp.allclose(out32, ref, atol=1e-4, rtol=1e-4)

    # ---- f32 path, tiled K (sweepable block_k), same result ----
    out32_t = roberta_classification_head(features, *p32,
                                          num_classes=NUM_CLASSES, block_k=3840)
    out32_t = jax.block_until_ready(out32_t)
    assert jnp.allclose(out32_t, ref, atol=1e-4, rtol=1e-4)

    # ---- bf16 production path: halves W1 HBM traffic; f32 MXU accumulation ----
    pbf = prepare_roberta_head_params(w_dense_t, b_dense, w_out_t, b_out,
                                      weight_dtype=jnp.bfloat16)
    x_bf = features.astype(jnp.bfloat16)
    out_bf = roberta_classification_head(x_bf, *pbf, num_classes=NUM_CLASSES)
    out_bf = jax.block_until_ready(out_bf)
    assert out_bf.shape == (BATCH, NUM_CLASSES)
    assert out_bf.dtype == jnp.float32          # logits always f32
    ref_bf = (jnp.tanh(x_bf.astype(jnp.float32) @ w_dense_t.astype(jnp.bfloat16).astype(jnp.float32).T
                       + b_dense)
              @ w_out_t.astype(jnp.bfloat16).astype(jnp.float32).T + b_out)
    assert jnp.allclose(out_bf, ref_bf, atol=5e-2, rtol=5e-2)

    print("KERNEL_OK")
</pallas_src>

<mosaic_0001>
module attributes {stable_mosaic.version = 11 : i64} {
  func.func @roberta_head_kernel(%arg0: i32, %arg1: memref<2x15360xf32, #tpu.memory_space<vmem>>, %arg2: memref<32x15360xf32, #tpu.memory_space<vmem>>, %arg3: memref<1x32xf32, #tpu.memory_space<vmem>>, %arg4: memref<32x128xf32, #tpu.memory_space<vmem>>, %arg5: memref<1x128xf32, #tpu.memory_space<vmem>>, %arg6: memref<2x128xf32, #tpu.memory_space<vmem>>, %arg7: memref<2x32xf32, #tpu.memory_space<vmem>>) attributes {dimension_semantics = [#tpu.dimension_semantics<arbitrary>], iteration_bounds = array<i64: 1>, scalar_prefetch = 0 : i64, scratch_operands = 1 : i64, tpu.core_type = #tpu.core_type<tc>, window_params = [{transform_indices = @transform_0, window_bounds = array<i64: 2, 15360>}, {transform_indices = @transform_1, window_bounds = array<i64: 32, 15360>}, {pipeline_mode = #tpu.pipeline_mode<synchronous>, transform_indices = @transform_2, window_bounds = array<i64: 1, 32>}, {pipeline_mode = #tpu.pipeline_mode<synchronous>, transform_indices = @transform_3, window_bounds = array<i64: 32, 128>}, {pipeline_mode = #tpu.pipeline_mode<synchronous>, transform_indices = @transform_4, window_bounds = array<i64: 1, 128>}, {pipeline_mode = #tpu.pipeline_mode<synchronous>, transform_indices = @transform_5, window_bounds = array<i64: 2, 128>}]} {
    %c0_i32 = arith.constant 0 : i32
    %0 = arith.cmpi eq, %arg0, %c0_i32 : i32
    %1 = arith.extui %0 : i1 to i32
    %c0_i32_0 = arith.constant 0 : i32
    %2 = arith.cmpi ne, %1, %c0_i32_0 : i32
    scf.if %2 {
      %cst_10 = arith.constant 0.000000e+00 : f32
      %12 = vector.broadcast %cst_10 : f32 to vector<2x32xf32>
      %c0_11 = arith.constant 0 : index
      %c0_12 = arith.constant 0 : index
      %13 = vector.load %arg7[%c0_11, %c0_12] : memref<2x32xf32, #tpu.memory_space<vmem>>, vector<2x32xf32>
      tpu.vector_store %arg7[%c0_11, %c0_12], %12 {strides = array<i32>} : memref<2x32xf32, #tpu.memory_space<vmem>>, vector<2x32xf32>,
    } else {
    }
    %c0 = arith.constant 0 : index
    %c0_1 = arith.constant 0 : index
    %3 = vector.load %arg7[%c0, %c0_1] : memref<2x32xf32, #tpu.memory_space<vmem>>, vector<2x32xf32>
    %c0_2 = arith.constant 0 : index
    %c0_3 = arith.constant 0 : index
    %4 = vector.load %arg1[%c0_2, %c0_3] : memref<2x15360xf32, #tpu.memory_space<vmem>>, vector<2x15360xf32>
    %c0_4 = arith.constant 0 : index
    %c0_5 = arith.constant 0 : index
    %5 = vector.load %arg2[%c0_4, %c0_5] : memref<32x15360xf32, #tpu.memory_space<vmem>>, vector<32x15360xf32>
    %cst = arith.constant dense<0.000000e+00> : vector<2x32xf32>
    %6 = tpu.matmul %4, %5, %cst {dimension_numbers = #tpu.dot_dimension_numbers<[1], [1], [0], [0], [0, 0, 1, 0], [], []>} : vector<2x15360xf32>, vector<32x15360xf32>, vector<2x32xf32> -> vector<2x32xf32>
    %7 = arith.addf %3, %6 : vector<2x32xf32>
    %c0_6 = arith.constant 0 : index
    %c0_7 = arith.constant 0 : index
    %8 = vector.load %arg7[%c0_6, %c0_7] : memref<2x32xf32, #tpu.memory_space<vmem>>, vector<2x32xf32>
    tpu.vector_store %arg7[%c0_6, %c0_7], %7 {strides = array<i32>} : memref<2x32xf32, #tpu.memory_space<vmem>>, vector<2x32xf32>,
    %c0_i32_8 = arith.constant 0 : i32
    %9 = arith.cmpi eq, %arg0, %c0_i32_8 : i32
    %10 = arith.extui %9 : i1 to i32
    %c0_i32_9 = arith.constant 0 : i32
    %11 = arith.cmpi ne, %10, %c0_i32_9 : i32
    scf.if %11 {
      %c0_10 = arith.constant 0 : index
      %c0_11 = arith.constant 0 : index
      %12 = vector.load %arg7[%c0_10, %c0_11] : memref<2x32xf32, #tpu.memory_space<vmem>>, vector<2x32xf32>
      %c0_12 = arith.constant 0 : index
      %c0_13 = arith.constant 0 : index
      %13 = vector.load %arg3[%c0_12, %c0_13] : memref<1x32xf32, #tpu.memory_space<vmem>>, vector<1x32xf32>
      %14 = vector.broadcast %13 : vector<1x32xf32> to vector<2x32xf32>
      %15 = arith.addf %12, %14 : vector<2x32xf32>
      %16 = math.tanh %15 : vector<2x32xf32>
      %c0_14 = arith.constant 0 : index
      %c0_15 = arith.constant 0 : index
      %17 = vector.load %arg4[%c0_14, %c0_15] : memref<32x128xf32, #tpu.memory_space<vmem>>, vector<32x128xf32>
      %cst_16 = arith.constant dense<0.000000e+00> : vector<2x128xf32>
      %18 = tpu.matmul %16, %17, %cst_16 {dimension_numbers = #tpu.dot_dimension_numbers<[1], [0], [0], [1], [0, 0, 1, 1], [], []>} : vector<2x32xf32>, vector<32x128xf32>, vector<2x128xf32> -> vector<2x128xf32>
      %c0_17 = arith.constant 0 : index
      %c0_18 = arith.constant 0 : index
      %19 = vector.load %arg5[%c0_17, %c0_18] : memref<1x128xf32, #tpu.memory_space<vmem>>, vector<1x128xf32>
      %20 = vector.broadcast %19 : vector<1x128xf32> to vector<2x128xf32>
      %21 = arith.addf %18, %20 : vector<2x128xf32>
      %c0_19 = arith.constant 0 : index
      %c0_20 = arith.constant 0 : index
      %22 = vector.load %arg6[%c0_19, %c0_20] : memref<2x128xf32, #tpu.memory_space<vmem>>, vector<2x128xf32>
      tpu.vector_store %arg6[%c0_19, %c0_20], %21 {strides = array<i32>} : memref<2x128xf32, #tpu.memory_space<vmem>>, vector<2x128xf32>,
    } else {
    }
    return
  }
  func.func @transform_0(%arg0: i32) -> (i32, i32) {
    %c0_i32 = arith.constant 0 : i32
    %c0_i32_0 = arith.constant 0 : i32
    return %c0_i32, %arg0 : i32, i32
  }
  func.func @transform_1(%arg0: i32) -> (i32, i32) {
    %c0_i32 = arith.constant 0 : i32
    %c0_i32_0 = arith.constant 0 : i32
    return %c0_i32, %arg0 : i32, i32
  }
  func.func @transform_2(%arg0: i32) -> (i32, i32) {
    %c0_i32 = arith.constant 0 : i32
    %c0_i32_0 = arith.constant 0 : i32
    %c0_i32_1 = arith.constant 0 : i32
    return %c0_i32, %c0_i32_0 : i32, i32
  }
  func.func @transform_3(%arg0: i32) -> (i32, i32) {
    %c0_i32 = arith.constant 0 : i32
    %c0_i32_0 = arith.constant 0 : i32
    %c0_i32_1 = arith.constant 0 : i32
    return %c0_i32, %c0_i32_0 : i32, i32
  }
  func.func @transform_4(%arg0: i32) -> (i32, i32) {
    %c0_i32 = arith.constant 0 : i32
    %c0_i32_0 = arith.constant 0 : i32
    %c0_i32_1 = arith.constant 0 : i32
    return %c0_i32, %c0_i32_0 : i32, i32
  }
  func.func @transform_5(%arg0: i32) -> (i32, i32) {
    %c0_i32 = arith.constant 0 : i32
    %c0_i32_0 = arith.constant 0 : i32
    %c0_i32_1 = arith.constant 0 : i32
    return %c0_i32, %c0_i32_0 : i32, i32
  }
}

</mosaic_0001>

<bundles_post_ra>
// kernel: roberta_classification_head.1
= control target key start
LH: loop header
LB: loop body
LE: loop exit
PB: predicated region body
PF: predicated region fallthrough
CT: control target
= control target key end

     0   :  { %10 = vsyncpa [#allocation4], 0  ;;  %s6450_s0 = inlined_call_operand.hbm [shape: f32[2,15360], index: 0, kind: input, shape index: {}]   ;;  %s6451_s1 = inlined_call_operand.hbm [shape: f32[32,15360], index: 1, kind: input, shape index: {}]   ;;  %s6452_s2 = inlined_call_operand.hbm [shape: f32[1,32], index: 2, kind: input, shape index: {}]   ;;  %s6453_s3 = inlined_call_operand.hbm [shape: f32[32,128], index: 3, kind: input, shape index: {}]   ;;  %s6454_s4 = inlined_call_operand.hbm [shape: f32[1,128], index: 4, kind: input, shape index: {}]   ;;  %s6455_s5 = inlined_call_operand.hbm [shape: f32[2,128], index: 5, kind: output, shape index: {}]  }
   0x1   :  { %11 = vsyncpa [#allocation7], 0 }
   0x2   :  { %12 = vsyncpa [#allocation10], 0 }
   0x3   :  { %13 = vsyncpa [#allocation5], 0  ;;  %s6270_s18 = smov [#allocation6]   ;;  %s6130_s22 = scalar_lea.hbm %s6451_s1, 61440 }
   0x4   :  { %s29_s19 = sshll.u32 %s6270_s18, 4  ;;  %p6131_p0 = scmp.ne.s32.totalorder %s6451_s1, %s6130_s22  ;;  %s30_s19 = int_to_ptr.vmem [resolvable:$true] %s29_s19 }
   0x5   :  { %p6134_p1 = scmp.lt.u32.totalorder %s6130_s22, %s6451_s1 }
   0x7   :  { %p6136_p2 = pnand %p6134_p1, %p6131_p0 }
   0x9   :  { %6139 = shalt.err (!%p6136_p2)
}
   0xa   :  { %s6140_s27 = scalar_lea.vmem %s30_s19, 61440  ;;  %p6145_p4 = scmp.lt.s32.totalorder %s30_s19, %s30_s19 }
   0xb   :  { %p6141_p3 = scmp.ne.s32.totalorder %s30_s19, %s6140_s27  ;;  %p6146_p5 = scmp.lt.s32.totalorder %s6140_s27, %s6140_s27 }
   0xd   :  { %p6147_p6 = por %p6146_p5, %p6145_p4 }
   0xf   :  { %p6148_p7 = pnand %p6147_p6, %p6141_p3 }
  0x11   :  { %6151 = shalt.err (!%p6148_p7)
}
  0x12   :  { %s6271_s28 = smov 15360   ;;  %s6272_s29 = smov 960  }
  0x13   :  { %35 = dma.hbm_to_vmem [thread:$0]  %s6451_s1, 61440, %s30_s19, [#allocation7], %s6271_s28, %s6271_s28, %s6272_s29  }
  0x14   :  { %s6273_s7 = smov [#allocation9]   ;;  %s6152_s11 = scalar_lea.hbm %s6453_s3, 512 }
  0x15   :  { %s51_s8 = sshll.u32 %s6273_s7, 4  ;;  %p6153_p8 = scmp.ne.s32.totalorder %s6453_s3, %s6152_s11  ;;  %s52_s8 = int_to_ptr.vmem [resolvable:$true] %s51_s8 }
  0x16   :  { %p6156_p9 = scmp.lt.u32.totalorder %s6152_s11, %s6453_s3 }
  0x18   :  { %p6158_p10 = pnand %p6156_p9, %p6153_p8 }
  0x1a   :  { %6161 = shalt.err (!%p6158_p10)
}
  0x1b   :  { %s6162_s16 = scalar_lea.vmem %s52_s8, 512  ;;  %p6167_p12 = scmp.lt.s32.totalorder %s52_s8, %s52_s8 }
  0x1c   :  { %p6163_p11 = scmp.ne.s32.totalorder %s52_s8, %s6162_s16  ;;  %p6168_p13 = scmp.lt.s32.totalorder %s6162_s16, %s6162_s16 }
  0x1e   :  { %p6169_p0 = por %p6168_p13, %p6167_p12 }
  0x20   :  { %p6170_p1 = pnand %p6169_p0, %p6163_p11 }
  0x22   :  { %6173 = shalt.err (!%p6170_p1)
}
  0x23   :  { %s6274_s1 = smov 128   ;;  %s6275_s17 = smov 8  }
  0x24   :  { %57 = dma.hbm_to_vmem [thread:$0]  %s6453_s3, 512, %s52_s8, [#allocation10], %s6274_s1, %s6274_s1, %s6275_s17  }
  0x25   :  { %s6276_s20 = smov [#allocation3]   ;;  %s6277_s22 = smov [#allocation8]  }
  0x26   :  { %s20_s21 = sshll.u32 %s6276_s20, 4  ;;  %s42_s23 = sshll.u32 %s6277_s22, 4  ;;  %s21_s21 = int_to_ptr.vmem [resolvable:$true] %s20_s21  ;;  %s43_s23 = int_to_ptr.vmem [resolvable:$true] %s42_s23 }
  0x27   :  { %s6174_s26 = scalar_lea.hbm %s6450_s0, 3840 }
  0x28   :  { %p6175_p2 = scmp.ne.s32.totalorder %s6450_s0, %s6174_s26  ;;  %p6178_p3 = scmp.lt.u32.totalorder %s6174_s26, %s6450_s0 }
  0x2a   :  { %p6180_p4 = pnand %p6178_p3, %p6175_p2 }
  0x2c   :  { %6183 = shalt.err (!%p6180_p4)
}
  0x2d   :  { %s6184_s3 = scalar_lea.vmem %s21_s21, 3840  ;;  %p6189_p6 = scmp.lt.s32.totalorder %s21_s21, %s21_s21 }
  0x2e   :  { %p6185_p5 = scmp.ne.s32.totalorder %s21_s21, %s6184_s3  ;;  %p6190_p7 = scmp.lt.s32.totalorder %s6184_s3, %s6184_s3 }
  0x30   :  { %p6191_p8 = por %p6190_p7, %p6189_p6 }
  0x32   :  { %p6192_p9 = pnand %p6191_p8, %p6185_p5 }
  0x34   :  { %6195 = shalt.err (!%p6192_p9)
}
  0x35   :  { %23 = dma.hbm_to_vmem [thread:$0]  %s6450_s0, 3840, %s21_s21, [#allocation4]  }
  0x36   :  { %s6196_s10 = scalar_lea.hbm %s6452_s2, 16 }
  0x37   :  { %p6197_p10 = scmp.ne.s32.totalorder %s6452_s2, %s6196_s10  ;;  %p6200_p11 = scmp.lt.u32.totalorder %s6196_s10, %s6452_s2 }
  0x39   :  { %p6202_p12 = pnand %p6200_p11, %p6197_p10 }
  0x3b   :  { %6205 = shalt.err (!%p6202_p12)
}
  0x3c   :  { %s6206_s15 = scalar_lea.vmem %s43_s23, 16  ;;  %s6210_s16 = scalar_lea.vmem %s43_s23, 32 }
  0x3d   :  { %p6207_p13 = scmp.ne.s32.totalorder %s43_s23, %s6206_s15  ;;  %p6211_p0 = scmp.lt.s32.totalorder %s43_s23, %s43_s23 }
  0x3e   :  { %p6212_p1 = scmp.lt.s32.totalorder %s6210_s16, %s6206_s15 }
  0x40   :  { %p6213_p2 = por %p6212_p1, %p6211_p0 }
  0x42   :  { %p6214_p3 = pnand %p6213_p2, %p6207_p13 }
  0x44   :  { %6217 = shalt.err (!%p6214_p3)
}
  0x45   :  { %45 = dma.hbm_to_vmem [thread:$0]  %s6452_s2, 16, %s43_s23, [#allocation7]  }
  0x46   :  { %s6278_s17 = smov [#allocation11]   ;;  %s6218_s21 = scalar_lea.hbm %s6454_s4, 16 }
  0x47   :  { %s64_s18 = sshll.u32 %s6278_s17, 4  ;;  %p6219_p4 = scmp.ne.s32.totalorder %s6454_s4, %s6218_s21  ;;  %s65_s18 = int_to_ptr.vmem [resolvable:$true] %s64_s18 }
  0x48   :  { %p6222_p5 = scmp.lt.u32.totalorder %s6218_s21, %s6454_s4 }
  0x4a   :  { %p6224_p6 = pnand %p6222_p5, %p6219_p4 }
  0x4c   :  { %6227 = shalt.err (!%p6224_p6)
}
  0x4d   :  { %s6228_s27 = scalar_lea.vmem %s65_s18, 16  ;;  %s6232_s2 = scalar_lea.vmem %s65_s18, 32 }
  0x4e   :  { %p6229_p7 = scmp.ne.s32.totalorder %s65_s18, %s6228_s27  ;;  %p6233_p8 = scmp.lt.s32.totalorder %s65_s18, %s65_s18 }
  0x4f   :  { %p6234_p9 = scmp.lt.s32.totalorder %s6232_s2, %s6228_s27 }
  0x51   :  { %p6235_p10 = por %p6234_p9, %p6233_p8 }
  0x53   :  { %p6236_p11 = pnand %p6235_p10, %p6229_p7 }
  0x55   :  { %6239 = shalt.err (!%p6236_p11)
}
  0x56   :  { %67 = dma.hbm_to_vmem [thread:$0]  %s6454_s4, 16, %s65_s18, [#allocation10]  }
  0x57   :  { %6262 = dma.done.wait [#allocation4], 3840  }
  0x58   :  { %6263 = vsyncadd [#allocation4], 4294963456 }
  0x59   :  { %6264 = dma.done.wait [#allocation7], 61456  }
  0x5a   :  { %6265 = vsyncadd [#allocation7], 4294905840 }
  0x5b   :  { %6266 = dma.done.wait [#allocation10], 528  }
  0x5c   :  { %6267 = vsyncadd [#allocation10], 4294966768  ;;  %v6279_v0 = vmov 1983009808   ;;  %v634_v2 = vlaneseq  ;;  %v121_v5 = vld [vmem:[#allocation6 + $0x8] sm:$0xff]  ;;  %v120_v7 = vld [vmem:[#allocation6] sm:$0xff] }
  0x5d   :  { %v632_v1 = vunpack.c.l.s4 %v6279_v0  ;;  %v241_v6 = vld [vmem:[#allocation6 + $0x3c8] sm:$0xff]  ;;  %v240_v9 = vld [vmem:[#allocation6 + $0x3c0] sm:$0xff]  ;;  %v123_v10 = vld [vmem:[#allocation6 + $0x18] sm:$0xff]  ;;  %vm87_vm0 = vcmask 254976   ;;  %vm6282_vm1 = vmmov 0   ;;  %vm5487_vm2 = vcmask 261120  }
  0x5e   :  { %v635_v4 = vshrl.u32 %v634_v2, 7  ;;  %v5598_v8 = vpack.c.bf16 %v241_v6, %v121_v5  ;;  %v243_v11 = vld [vmem:[#allocation6 + $0x3d8] sm:$0xff]  ;;  %v5600_v12 = vpack.c.bf16 %v240_v9, %v120_v7  ;;  %v122_v14 = vld [vmem:[#allocation6 + $0x10] sm:$0xff]  ;;  %v361_v16 = vld [vmem:[#allocation6 + $0x788] sm:$0xff]  ;;  %s6283_s4 = smov [#allocation12]  }
  0x5f   :  { %v633_v3 = vunpack.c.0.s8 %v632_v1  ;;  %v5606_v13 = vpack.c.bf16 %v243_v11, %v123_v10  ;;  %v242_v15 = vld [vmem:[#allocation6 + $0x3d0] sm:$0xff]  ;;  %v481_v19 = vld [vmem:[#allocation6 + $0xb48] sm:$0xff]  ;;  %v360_v21 = vld [vmem:[#allocation6 + $0x780] sm:$0xff]  ;;  %s5568_s29 = sshll.u32 %s6283_s4, 4  ;;  %s5569_s29 = int_to_ptr.vmem [resolvable:$true] %s5568_s29 }
  0x60   :  { %5599 = vmatprep.subr.bf16.mxu0 %v5598_v8  ;;  %v5608_v18 = vpack.c.bf16 %v242_v15, %v122_v14  ;;  %v5602_v20 = vpack.c.bf16 %v481_v19, %v361_v16  ;;  %v363_v22 = vld [vmem:[#allocation6 + $0x798] sm:$0xff]  ;;  %v480_v24 = vld [vmem:[#allocation6 + $0xb40] sm:$0xff]  ;;  %v362_v26 = vld [vmem:[#allocation6 + $0x790] sm:$0xff]  ;;  %s6240_s30 = scalar_lea.vmem %s5569_s29, 32  ;;  %p6245_p13 = scmp.lt.s32.totalorder %s5569_s29, %s5569_s29 }
  0x61   :  { %v6374_v17 = vsub.s32 %v633_v3, %v635_v4  ;;  %5601 = vmatpush1.bf16.xpose.msra.mxu0 %v5600_v12  ;;  %5607 = vmatprep.subr.bf16.mxu1 %v5606_v13  ;;  %v483_v23 = vld [vmem:[#allocation6 + $0xb58] sm:$0xff]  ;;  %v90_v27 = vld [vmem:[#allocation3] sm:$0xff]  ;;  %v125_v31 = vld [vmem:[#allocation6 + $0x28] sm:$0xff]  ;;  %v5604_v35 = vpack.c.bf16 %v480_v24, %v360_v21  ;;  %p6241_p12 = scmp.ne.s32.totalorder %s5569_s29, %s6240_s30  ;;  %p6246_p0 = scmp.lt.s32.totalorder %s6240_s30, %s6240_s30 }
  0x62   :  { %5609 = vmatpush1.bf16.xpose.msra.mxu1 %v5608_v18  ;;  %v5610_v25 = vpack.c.bf16 %v483_v23, %v363_v22  ;;  %5603 = vmatprep.subr.bf16.mxu0 %v5602_v20  ;;  %v482_v28 = vld [vmem:[#allocation6 + $0xb50] sm:$0xff]  ;;  %v630_v30 = vcombine.high %v90_v27, %v90_v27  ;;  %v245_v32 = vld [vmem:[#allocation6 + $0x3e8] sm:$0xff]  ;;  %v127_v33 = vld [vmem:[#allocation6 + $0x38] sm:$0xff] }
  0x63   :  { %v637_v29 = vrot.slane %v90_v27, %v6374_v17  ;;  %v247_v34 = vld [vmem:[#allocation6 + $0x3f8] sm:$0xff]  ;;  %v5612_v38 = vpack.c.bf16 %v482_v28, %v362_v26  ;;  %v5614_v39 = vpack.c.bf16 %v245_v32, %v125_v31  ;;  %v124_v44 = vld [vmem:[#allocation6 + $0x20] sm:$0xff]  ;;  %v126_v46 = vld [vmem:[#allocation6 + $0x30] sm:$0xff]  ;;  %p6247_p1 = por %p6246_p0, %p6245_p13 }
  0x64   :  { %5611 = vmatprep.subr.bf16.mxu1 %v5610_v25  ;;  %v644_v37 = vrot.slane %v630_v30, %v6374_v17  ;;  %v5622_v41 = vpack.c.bf16 %v247_v34, %v127_v33  ;;  %v91_v42 = vld [vmem:[#allocation3 + $0x8] sm:$0xff]  ;;  %v244_v45 = vld [vmem:[#allocation6 + $0x3e0] sm:$0xff]  ;;  %v246_v47 = vld [vmem:[#allocation6 + $0x3f0] sm:$0xff] }
  0x65   :  { %v645_v36 = vcombine.high %v637_v29, %v637_v29  ;;  %v647_v43 = vcombine.high %v91_v42, %v91_v42  ;;  %v365_v48 = vld [vmem:[#allocation6 + $0x7a8] sm:$0xff]  ;;  %v654_v50 = vrot.slane %v91_v42, %v6374_v17  ;;  %v367_v51 = vld [vmem:[#allocation6 + $0x7b8] sm:$0xff]  ;;  %v5616_v54 = vpack.c.bf16 %v244_v45, %v124_v44  ;;  %v364_v60 = vld [vmem:[#allocation6 + $0x7a0] sm:$0xff]  ;;  %p6248_p2 = pnand %p6247_p1, %p6241_p12 }
  0x66   :  { %v646_v40 = vcombine.high %v644_v37, %v644_v37  ;;  %v485_v49 = vld [vmem:[#allocation6 + $0xb68] sm:$0xff]  ;;  %v487_v52 = vld [vmem:[#allocation6 + $0xb78] sm:$0xff]  ;;  %v5624_v55 = vpack.c.bf16 %v246_v47, %v126_v46  ;;  %v484_v61 = vld [vmem:[#allocation6 + $0xb60] sm:$0xff] }
  0x67   :  { %1324 = vmatprep.mubr.f32.mxu0 %v645_v36  ;;  %v661_v53 = vrot.slane %v647_v43, %v6374_v17  ;;  %v5618_v56 = vpack.c.bf16 %v485_v49, %v365_v48  ;;  %v5626_v57 = vpack.c.bf16 %v487_v52, %v367_v51  ;;  %v662_v58 = vcombine.high %v654_v50, %v654_v50  ;;  %v366_v62 = vld [vmem:[#allocation6 + $0x7b0] sm:$0xff]  ;;  %v129_v0 = vld [vmem:[#allocation6 + $0x48] sm:$0xff]  ;;  %v131_v2 = vld [vmem:[#allocation6 + $0x58] sm:$0xff] }
  0x68   :  { %1394 = vmatprep.mubr.f32.mxu1 %v646_v40  ;;  %v486_v63 = vld [vmem:[#allocation6 + $0xb70] sm:$0xff]  ;;  %v249_v1 = vld [vmem:[#allocation6 + $0x408] sm:$0xff]  ;;  %v251_v3 = vld [vmem:[#allocation6 + $0x418] sm:$0xff]  ;;  %v5620_v4 = vpack.c.bf16 %v484_v61, %v364_v60 }
  0x69   :  { %5605 = vmatpush1.bf16.xpose.msra.mxu0 %v5604_v35  ;;  %v663_v59 = vcombine.high %v661_v53, %v661_v53  ;;  %v92_v5 = vld [vmem:[#allocation3 + $0x10] sm:$0xff]  ;;  %v5628_v6 = vpack.c.bf16 %v486_v63, %v366_v62  ;;  %v5630_v7 = vpack.c.bf16 %v249_v1, %v129_v0  ;;  %v5638_v8 = vpack.c.bf16 %v251_v3, %v131_v2  ;;  %v130_v12 = vld [vmem:[#allocation6 + $0x50] sm:$0xff]  ;;  %v369_v14 = vld [vmem:[#allocation6 + $0x7c8] sm:$0xff] }
  0x6a   :  { %5613 = vmatpush1.bf16.xpose.msra.mxu1 %v5612_v38  ;;  %5615 = vmatprep.subr.bf16.mxu0 %v5614_v39  ;;  %v664_v9 = vcombine.high %v92_v5, %v92_v5  ;;  %v128_v10 = vld [vmem:[#allocation6 + $0x40] sm:$0xff]  ;;  %v250_v13 = vld [vmem:[#allocation6 + $0x410] sm:$0xff]  ;;  %v489_v15 = vld [vmem:[#allocation6 + $0xb88] sm:$0xff]  ;;  %v671_v16 = vrot.slane %v92_v5, %v6374_v17 }
  0x6b   :  { %5623 = vmatprep.subr.bf16.mxu1 %v5622_v41  ;;  %v248_v11 = vld [vmem:[#allocation6 + $0x400] sm:$0xff]  ;;  %v371_v18 = vld [vmem:[#allocation6 + $0x7d8] sm:$0xff]  ;;  %v5640_v22 = vpack.c.bf16 %v250_v13, %v130_v12  ;;  %v5634_v23 = vpack.c.bf16 %v489_v15, %v369_v14  ;;  %v490_v30 = vld [vmem:[#allocation6 + $0xb90] sm:$0xff] }
  0x6c   :  { %v491_v19 = vld [vmem:[#allocation6 + $0xb98] sm:$0xff]  ;;  %v678_v20 = vrot.slane %v664_v9, %v6374_v17  ;;  %v5632_v21 = vpack.c.bf16 %v248_v11, %v128_v10  ;;  %v679_v25 = vcombine.high %v671_v16, %v671_v16  ;;  %v368_v27 = vld [vmem:[#allocation6 + $0x7c0] sm:$0xff]  ;;  %v133_v31 = vld [vmem:[#allocation6 + $0x68] sm:$0xff] }
  0x6d   :  { %v5642_v24 = vpack.c.bf16 %v491_v19, %v371_v18  ;;  %v488_v28 = vld [vmem:[#allocation6 + $0xb80] sm:$0xff]  ;;  %v253_v32 = vld [vmem:[#allocation6 + $0x428] sm:$0xff]  ;;  %v135_v33 = vld [vmem:[#allocation6 + $0x78] sm:$0xff] }
  0x6e   :  { %v680_v26 = vcombine.high %v678_v20, %v678_v20  ;;  %v255_v34 = vld [vmem:[#allocation6 + $0x438] sm:$0xff]  ;;  %v5636_v35 = vpack.c.bf16 %v488_v28, %v368_v27  ;;  %v93_v36 = vld [vmem:[#allocation3 + $0x18] sm:$0xff]  ;;  %v5646_v38 = vpack.c.bf16 %v253_v32, %v133_v31  ;;  %v132_v41 = vld [vmem:[#allocation6 + $0x60] sm:$0xff] }
  0x6f   :  { %v5654_v39 = vpack.c.bf16 %v255_v34, %v135_v33  ;;  %v681_v40 = vcombine.high %v93_v36, %v93_v36  ;;  %v252_v42 = vld [vmem:[#allocation6 + $0x420] sm:$0xff]  ;;  %v134_v43 = vld [vmem:[#allocation6 + $0x70] sm:$0xff]  ;;  %v373_v45 = vld [vmem:[#allocation6 + $0x7e8] sm:$0xff]  ;;  %v688_v47 = vrot.slane %v93_v36, %v6374_v17 }
  0x70   :  { %1325 = vmatmul.mubr.f32.vlgmr.msra.gmra.mrb[0].mxu0 %v637_v29  ;;  %v370_v29 = vld [vmem:[#allocation6 + $0x7d0] sm:$0xff]  ;;  %v493_v46 = vld [vmem:[#allocation6 + $0xba8] sm:$0xff]  ;;  %v375_v48 = vld [vmem:[#allocation6 + $0x7f8] sm:$0xff]  ;;  %v5648_v51 = vpack.c.bf16 %v252_v42, %v132_v41 }
  0x71   :  { %1395 = vmatmul.mubr.f32.vlgmr.msra.gmra.mrb[0].mxu1 %v644_v37  ;;  %5617 = vmatpush1.bf16.xpose.msra.mxu0 %v5616_v54  ;;  %v5644_v37 = vpack.c.bf16 %v490_v30, %v370_v29  ;;  %v254_v44 = vld [vmem:[#allocation6 + $0x430] sm:$0xff]  ;;  %v495_v49 = vld [vmem:[#allocation6 + $0xbb8] sm:$0xff]  ;;  %v137_v61 = vld [vmem:[#allocation6 + $0x88] sm:$0xff] }
  0x72   :  { %5625 = vmatpush1.bf16.xpose.msra.mxu1 %v5624_v55  ;;  %5619 = vmatprep.subr.bf16.mxu0 %v5618_v56  ;;  %v5656_v52 = vpack.c.bf16 %v254_v44, %v134_v43  ;;  %v5658_v54 = vpack.c.bf16 %v495_v49, %v375_v48  ;;  %v696_v55 = vcombine.high %v688_v47, %v688_v47  ;;  %v494_v60 = vld [vmem:[#allocation6 + $0xbb0] sm:$0xff]  ;;  %v257_v62 = vld [vmem:[#allocation6 + $0x448] sm:$0xff]  ;;  %v139_v63 = vld [vmem:[#allocation6 + $0x98] sm:$0xff] }
  0x73   :  { %5627 = vmatprep.subr.bf16.mxu1 %v5626_v57  ;;  %1464 = vmatprep.mubr.f32.mxu0 %v662_v58  ;;  %v372_v57 = vld [vmem:[#allocation6 + $0x7e0] sm:$0xff]  ;;  %v259_v0 = vld [vmem:[#allocation6 + $0x458] sm:$0xff]  ;;  %v94_v2 = vld [vmem:[#allocation3 + $0x20] sm:$0xff] }
  0x74   :  { %1534 = vmatprep.mubr.f32.mxu1 %v663_v59  ;;  %v492_v58 = vld [vmem:[#allocation6 + $0xba0] sm:$0xff]  ;;  %v374_v59 = vld [vmem:[#allocation6 + $0x7f0] sm:$0xff]  ;;  %v5670_v5 = vpack.c.bf16 %v259_v0, %v139_v63  ;;  %v377_v11 = vld [vmem:[#allocation6 + $0x808] sm:$0xff]  ;;  %v705_v13 = vrot.slane %v94_v2, %v6374_v17 }
  0x75   :  { %v5652_v1 = vpack.c.bf16 %v492_v58, %v372_v57  ;;  %v5660_v3 = vpack.c.bf16 %v494_v60, %v374_v59  ;;  %v138_v9 = vld [vmem:[#allocation6 + $0x90] sm:$0xff]  ;;  %v497_v12 = vld [vmem:[#allocation6 + $0xbc8] sm:$0xff]  ;;  %v379_v14 = vld [vmem:[#allocation6 + $0x818] sm:$0xff] }
  0x76   :  { %v258_v10 = vld [vmem:[#allocation6 + $0x450] sm:$0xff]  ;;  %v499_v15 = vld [vmem:[#allocation6 + $0xbd8] sm:$0xff]  ;;  %v141_v28 = vld [vmem:[#allocation6 + $0xa8] sm:$0xff] }
  0x77   :  { %v5672_v19 = vpack.c.bf16 %v258_v10, %v138_v9  ;;  %v498_v27 = vld [vmem:[#allocation6 + $0xbd0] sm:$0xff]  ;;  %v261_v29 = vld [vmem:[#allocation6 + $0x468] sm:$0xff]  ;;  %v143_v30 = vld [vmem:[#allocation6 + $0xb8] sm:$0xff] }
  0x78   :  { %v263_v31 = vld [vmem:[#allocation6 + $0x478] sm:$0xff]  ;;  %v262_v41 = vld [vmem:[#allocation6 + $0x470] sm:$0xff]  ;;  %v381_v42 = vld [vmem:[#allocation6 + $0x828] sm:$0xff] }
  0x79   :  { %5621 = vmatpush1.bf16.xpose.msra.mxu0 %v5620_v4  ;;  %v5662_v4 = vpack.c.bf16 %v257_v62, %v137_v61  ;;  %v95_v33 = vld [vmem:[#allocation3 + $0x28] sm:$0xff]  ;;  %v5686_v36 = vpack.c.bf16 %v263_v31, %v143_v30  ;;  %v501_v43 = vld [vmem:[#allocation6 + $0xbe8] sm:$0xff]  ;;  %v502_v57 = vld [vmem:[#allocation6 + $0xbf0] sm:$0xff] }
  0x7a   :  { %5629 = vmatpush1.bf16.xpose.msra.mxu1 %v5628_v6  ;;  %5631 = vmatprep.subr.bf16.mxu0 %v5630_v7  ;;  %v698_v6 = vcombine.high %v94_v2, %v94_v2  ;;  %v136_v7 = vld [vmem:[#allocation6 + $0x80] sm:$0xff]  ;;  %v722_v44 = vrot.slane %v95_v33, %v6374_v17  ;;  %v145_v58 = vld [vmem:[#allocation6 + $0xc8] sm:$0xff]  ;;  %v147_v60 = vld [vmem:[#allocation6 + $0xd8] sm:$0xff] }
  0x7b   :  { %5639 = vmatprep.subr.bf16.mxu1 %v5638_v8  ;;  %v256_v8 = vld [vmem:[#allocation6 + $0x440] sm:$0xff]  ;;  %v265_v59 = vld [vmem:[#allocation6 + $0x488] sm:$0xff]  ;;  %v267_v61 = vld [vmem:[#allocation6 + $0x498] sm:$0xff] }
  0x7c   :  { %v5664_v18 = vpack.c.bf16 %v256_v8, %v136_v7  ;;  %v96_v63 = vld [vmem:[#allocation3 + $0x30] sm:$0xff]  ;;  %v5702_v2 = vpack.c.bf16 %v267_v61, %v147_v60  ;;  %v266_v7 = vld [vmem:[#allocation6 + $0x490] sm:$0xff]  ;;  %v385_v8 = vld [vmem:[#allocation6 + $0x848] sm:$0xff] }
  0x7d   :  { %v505_v9 = vld [vmem:[#allocation6 + $0xc08] sm:$0xff]  ;;  %v739_v10 = vrot.slane %v96_v63, %v6374_v17  ;;  %v98_v60 = vld [vmem:[#allocation3 + $0x40] sm:$0xff] }
  0x7e   :  { %v97_v30 = vld [vmem:[#allocation3 + $0x38] sm:$0xff] }
  0x80   :  { %1465 = vmatmul.mubr.f32.vlgmr.msra.gmra.mrb[2].mxu0 %v654_v50  ;;  %v695_v50 = vrot.slane %v681_v40, %v6374_v17  ;;  %v142_v40 = vld [vmem:[#allocation6 + $0xb0] sm:$0xff] }
  0x81   :  { %5633 = vmatpush1.bf16.xpose.msra.mxu0 %v5632_v21  ;;  %1535 = vmatmul.mubr.f32.vlgmr.msra.gmra.mrb[2].mxu1 %v661_v53  ;;  %v5650_v53 = vpack.c.bf16 %v493_v46, %v373_v45  ;;  %v5674_v21 = vpack.c.bf16 %v499_v15, %v379_v14  ;;  %v383_v45 = vld [vmem:[#allocation6 + $0x838] sm:$0xff]  ;;  %v5688_v49 = vpack.c.bf16 %v262_v41, %v142_v40  ;;  %v509_v40 = vld [vmem:[#allocation6 + $0xc28] sm:$0xff] }
  0x82   :  { %5641 = vmatpush1.bf16.xpose.msra.mxu1 %v5640_v22  ;;  %5635 = vmatprep.subr.bf16.mxu0 %v5634_v23  ;;  %v697_v56 = vcombine.high %v695_v50, %v695_v50  ;;  %v713_v22 = vcombine.high %v705_v13, %v705_v13  ;;  %v503_v46 = vld [vmem:[#allocation6 + $0xbf8] sm:$0xff]  ;;  %v756_v41 = vrot.slane %v97_v30, %v6374_v17 }
  0x83   :  { %5643 = vmatprep.subr.bf16.mxu1 %v5642_v24  ;;  %1604 = vmatprep.mubr.f32.mxu0 %v679_v25  ;;  %v376_v24 = vld [vmem:[#allocation6 + $0x800] sm:$0xff] }
  0x84   :  { %1674 = vmatprep.mubr.f32.mxu1 %v680_v26  ;;  %v496_v25 = vld [vmem:[#allocation6 + $0xbc0] sm:$0xff]  ;;  %v378_v26 = vld [vmem:[#allocation6 + $0x810] sm:$0xff] }
  0x85   :  { %v5668_v32 = vpack.c.bf16 %v496_v25, %v376_v24  ;;  %v5676_v34 = vpack.c.bf16 %v498_v27, %v378_v26  ;;  %v506_v24 = vld [vmem:[#allocation6 + $0xc10] sm:$0xff]  ;;  %v149_v25 = vld [vmem:[#allocation6 + $0xe8] sm:$0xff]  ;;  %v151_v27 = vld [vmem:[#allocation6 + $0xf8] sm:$0xff] }
  0x86   :  { %v269_v26 = vld [vmem:[#allocation6 + $0x4a8] sm:$0xff] }
  0x89   :  { %5637 = vmatpush1.bf16.xpose.msra.mxu0 %v5636_v35  ;;  %v5678_v35 = vpack.c.bf16 %v261_v29, %v141_v28  ;;  %v271_v28 = vld [vmem:[#allocation6 + $0x4b8] sm:$0xff] }
  0x8a   :  { %5645 = vmatpush1.bf16.xpose.msra.mxu1 %v5644_v37  ;;  %5647 = vmatprep.subr.bf16.mxu0 %v5646_v38  ;;  %v715_v37 = vcombine.high %v95_v33, %v95_v33  ;;  %v140_v38 = vld [vmem:[#allocation6 + $0xa0] sm:$0xff]  ;;  %v5718_v33 = vpack.c.bf16 %v271_v28, %v151_v27  ;;  %v99_v27 = vld [vmem:[#allocation3 + $0x48] sm:$0xff] }
  0x8b   :  { %5655 = vmatprep.subr.bf16.mxu1 %v5654_v39  ;;  %v260_v39 = vld [vmem:[#allocation6 + $0x460] sm:$0xff] }
  0x8c   :  { %v5680_v48 = vpack.c.bf16 %v260_v39, %v140_v38  ;;  %v270_v38 = vld [vmem:[#allocation6 + $0x4b0] sm:$0xff]  ;;  %v389_v39 = vld [vmem:[#allocation6 + $0x868] sm:$0xff] }
  0x90   :  { %1605 = vmatmul.mubr.f32.vlgmr.msra.gmra.mrb[4].mxu0 %v671_v16  ;;  %v712_v16 = vrot.slane %v698_v6, %v6374_v17  ;;  %v146_v6 = vld [vmem:[#allocation6 + $0xd0] sm:$0xff] }
  0x91   :  { %5649 = vmatpush1.bf16.xpose.msra.mxu0 %v5648_v51  ;;  %1675 = vmatmul.mubr.f32.vlgmr.msra.gmra.mrb[4].mxu1 %v678_v20  ;;  %v5666_v20 = vpack.c.bf16 %v497_v12, %v377_v11  ;;  %v5690_v51 = vpack.c.bf16 %v503_v46, %v383_v45  ;;  %v387_v11 = vld [vmem:[#allocation6 + $0x858] sm:$0xff]  ;;  %v5704_v15 = vpack.c.bf16 %v266_v7, %v146_v6  ;;  %v513_v6 = vld [vmem:[#allocation6 + $0xc48] sm:$0xff] }
  0x92   :  { %5657 = vmatpush1.bf16.xpose.msra.mxu1 %v5656_v52  ;;  %5651 = vmatprep.subr.bf16.mxu0 %v5650_v53  ;;  %v714_v23 = vcombine.high %v712_v16, %v712_v16  ;;  %v730_v52 = vcombine.high %v722_v44, %v722_v44  ;;  %v507_v12 = vld [vmem:[#allocation6 + $0xc18] sm:$0xff]  ;;  %v773_v7 = vrot.slane %v98_v60, %v6374_v17 }
  0x93   :  { %5659 = vmatprep.subr.bf16.mxu1 %v5658_v54  ;;  %1744 = vmatprep.mubr.f32.mxu0 %v696_v55  ;;  %v380_v54 = vld [vmem:[#allocation6 + $0x820] sm:$0xff] }
  0x94   :  { %1814 = vmatprep.mubr.f32.mxu1 %v697_v56  ;;  %v500_v55 = vld [vmem:[#allocation6 + $0xbe0] sm:$0xff]  ;;  %v382_v56 = vld [vmem:[#allocation6 + $0x830] sm:$0xff] }
  0x95   :  { %v5684_v62 = vpack.c.bf16 %v500_v55, %v380_v54  ;;  %v5692_v0 = vpack.c.bf16 %v502_v57, %v382_v56  ;;  %v510_v54 = vld [vmem:[#allocation6 + $0xc30] sm:$0xff]  ;;  %v153_v55 = vld [vmem:[#allocation6 + $0x108] sm:$0xff]  ;;  %v155_v57 = vld [vmem:[#allocation6 + $0x118] sm:$0xff] }
  0x96   :  { %v273_v56 = vld [vmem:[#allocation6 + $0x4c8] sm:$0xff] }
  0x99   :  { %5653 = vmatpush1.bf16.xpose.msra.mxu0 %v5652_v1  ;;  %v5694_v1 = vpack.c.bf16 %v265_v59, %v145_v58  ;;  %v275_v58 = vld [vmem:[#allocation6 + $0x4d8] sm:$0xff] }
  0x9a   :  { %5661 = vmatpush1.bf16.xpose.msra.mxu1 %v5660_v3  ;;  %5663 = vmatprep.subr.bf16.mxu0 %v5662_v4  ;;  %v732_v3 = vcombine.high %v96_v63, %v96_v63  ;;  %v144_v4 = vld [vmem:[#allocation6 + $0xc0] sm:$0xff]  ;;  %v5734_v63 = vpack.c.bf16 %v275_v58, %v155_v57 }
  0x9b   :  { %5671 = vmatprep.subr.bf16.mxu1 %v5670_v5  ;;  %v264_v5 = vld [vmem:[#allocation6 + $0x480] sm:$0xff] }
  0x9c   :  { %v5696_v14 = vpack.c.bf16 %v264_v5, %v144_v4  ;;  %v274_v4 = vld [vmem:[#allocation6 + $0x4d0] sm:$0xff]  ;;  %v393_v5 = vld [vmem:[#allocation6 + $0x888] sm:$0xff]  ;;  %v100_v57 = vld [vmem:[#allocation3 + $0x50] sm:$0xff] }
  0xa0   :  { %1745 = vmatmul.mubr.f32.vlgmr.msra.gmra.mrb[6].mxu0 %v688_v47  ;;  %v729_v47 = vrot.slane %v715_v37, %v6374_v17  ;;  %v150_v37 = vld [vmem:[#allocation6 + $0xf0] sm:$0xff] }
  0xa1   :  { %5665 = vmatpush1.bf16.xpose.msra.mxu0 %v5664_v18  ;;  %1815 = vmatmul.mubr.f32.vlgmr.msra.gmra.mrb[6].mxu1 %v695_v50  ;;  %v5682_v50 = vpack.c.bf16 %v501_v43, %v381_v42  ;;  %v5706_v18 = vpack.c.bf16 %v507_v12, %v387_v11  ;;  %v391_v42 = vld [vmem:[#allocation6 + $0x878] sm:$0xff]  ;;  %v5720_v46 = vpack.c.bf16 %v270_v38, %v150_v37  ;;  %v517_v37 = vld [vmem:[#allocation6 + $0xc68] sm:$0xff] }
  0xa2   :  { %5673 = vmatpush1.bf16.xpose.msra.mxu1 %v5672_v19  ;;  %5667 = vmatprep.subr.bf16.mxu0 %v5666_v20  ;;  %v731_v53 = vcombine.high %v729_v47, %v729_v47  ;;  %v747_v19 = vcombine.high %v739_v10, %v739_v10  ;;  %v511_v43 = vld [vmem:[#allocation6 + $0xc38] sm:$0xff]  ;;  %v790_v38 = vrot.slane %v99_v27, %v6374_v17 }
  0xa3   :  { %5675 = vmatprep.subr.bf16.mxu1 %v5674_v21  ;;  %1884 = vmatprep.mubr.f32.mxu0 %v713_v22  ;;  %v384_v21 = vld [vmem:[#allocation6 + $0x840] sm:$0xff] }
  0xa4   :  { %1954 = vmatprep.mubr.f32.mxu1 %v714_v23  ;;  %v504_v22 = vld [vmem:[#allocation6 + $0xc00] sm:$0xff]  ;;  %v386_v23 = vld [vmem:[#allocation6 + $0x850] sm:$0xff] }
  0xa5   :  { %v5700_v29 = vpack.c.bf16 %v504_v22, %v384_v21  ;;  %v5708_v31 = vpack.c.bf16 %v506_v24, %v386_v23  ;;  %v514_v21 = vld [vmem:[#allocation6 + $0xc50] sm:$0xff]  ;;  %v157_v22 = vld [vmem:[#allocation6 + $0x128] sm:$0xff]  ;;  %v159_v24 = vld [vmem:[#allocation6 + $0x138] sm:$0xff] }
  0xa6   :  { %v277_v23 = vld [vmem:[#allocation6 + $0x4e8] sm:$0xff] }
  0xa9   :  { %5669 = vmatpush1.bf16.xpose.msra.mxu0 %v5668_v32  ;;  %v5710_v32 = vpack.c.bf16 %v269_v26, %v149_v25  ;;  %v279_v25 = vld [vmem:[#allocation6 + $0x4f8] sm:$0xff] }
  0xaa   :  { %5677 = vmatpush1.bf16.xpose.msra.mxu1 %v5676_v34  ;;  %5679 = vmatprep.subr.bf16.mxu0 %v5678_v35  ;;  %v749_v34 = vcombine.high %v97_v30, %v97_v30  ;;  %v148_v35 = vld [vmem:[#allocation6 + $0xe0] sm:$0xff]  ;;  %v5750_v30 = vpack.c.bf16 %v279_v25, %v159_v24  ;;  %v101_v24 = vld [vmem:[#allocation3 + $0x58] sm:$0xff] }
  0xab   :  { %5687 = vmatprep.subr.bf16.mxu1 %v5686_v36  ;;  %v268_v36 = vld [vmem:[#allocation6 + $0x4a0] sm:$0xff] }
  0xac   :  { %v5712_v45 = vpack.c.bf16 %v268_v36, %v148_v35  ;;  %v278_v35 = vld [vmem:[#allocation6 + $0x4f0] sm:$0xff]  ;;  %v397_v36 = vld [vmem:[#allocation6 + $0x8a8] sm:$0xff] }
  0xb0   :  { %1885 = vmatmul.mubr.f32.vlgmr.msra.gmra.mrb[8].mxu0 %v705_v13  ;;  %v746_v13 = vrot.slane %v732_v3, %v6374_v17  ;;  %v154_v3 = vld [vmem:[#allocation6 + $0x110] sm:$0xff] }
  0xb1   :  { %5681 = vmatpush1.bf16.xpose.msra.mxu0 %v5680_v48  ;;  %1955 = vmatmul.mubr.f32.vlgmr.msra.gmra.mrb[8].mxu1 %v712_v16  ;;  %v5698_v16 = vpack.c.bf16 %v505_v9, %v385_v8  ;;  %v5722_v48 = vpack.c.bf16 %v511_v43, %v391_v42  ;;  %v395_v8 = vld [vmem:[#allocation6 + $0x898] sm:$0xff]  ;;  %v5736_v12 = vpack.c.bf16 %v274_v4, %v154_v3  ;;  %v521_v3 = vld [vmem:[#allocation6 + $0xc88] sm:$0xff] }
  0xb2   :  { %5689 = vmatpush1.bf16.xpose.msra.mxu1 %v5688_v49  ;;  %5683 = vmatprep.subr.bf16.mxu0 %v5682_v50  ;;  %v748_v20 = vcombine.high %v746_v13, %v746_v13  ;;  %v764_v49 = vcombine.high %v756_v41, %v756_v41  ;;  %v515_v9 = vld [vmem:[#allocation6 + $0xc58] sm:$0xff]  ;;  %v807_v4 = vrot.slane %v100_v57, %v6374_v17 }
  0xb3   :  { %5691 = vmatprep.subr.bf16.mxu1 %v5690_v51  ;;  %2024 = vmatprep.mubr.f32.mxu0 %v730_v52  ;;  %v388_v51 = vld [vmem:[#allocation6 + $0x860] sm:$0xff] }
  0xb4   :  { %2094 = vmatprep.mubr.f32.mxu1 %v731_v53  ;;  %v508_v52 = vld [vmem:[#allocation6 + $0xc20] sm:$0xff]  ;;  %v390_v53 = vld [vmem:[#allocation6 + $0x870] sm:$0xff] }
  0xb5   :  { %v5716_v59 = vpack.c.bf16 %v508_v52, %v388_v51  ;;  %v5724_v61 = vpack.c.bf16 %v510_v54, %v390_v53  ;;  %v518_v51 = vld [vmem:[#allocation6 + $0xc70] sm:$0xff]  ;;  %v161_v52 = vld [vmem:[#allocation6 + $0x148] sm:$0xff]  ;;  %v163_v54 = vld [vmem:[#allocation6 + $0x158] sm:$0xff] }
  0xb6   :  { %v281_v53 = vld [vmem:[#allocation6 + $0x508] sm:$0xff] }
  0xb9   :  { %5685 = vmatpush1.bf16.xpose.msra.mxu0 %v5684_v62  ;;  %v5726_v62 = vpack.c.bf16 %v273_v56, %v153_v55  ;;  %v283_v55 = vld [vmem:[#allocation6 + $0x518] sm:$0xff] }
  0xba   :  { %5693 = vmatpush1.bf16.xpose.msra.mxu1 %v5692_v0  ;;  %5695 = vmatprep.subr.bf16.mxu0 %v5694_v1  ;;  %v766_v0 = vcombine.high %v98_v60, %v98_v60  ;;  %v152_v1 = vld [vmem:[#allocation6 + $0x100] sm:$0xff]  ;;  %v5766_v60 = vpack.c.bf16 %v283_v55, %v163_v54  ;;  %v102_v54 = vld [vmem:[#allocation3 + $0x60] sm:$0xff] }
  0xbb   :  { %5703 = vmatprep.subr.bf16.mxu1 %v5702_v2  ;;  %v272_v2 = vld [vmem:[#allocation6 + $0x4c0] sm:$0xff] }
  0xbc   :  { %v5728_v11 = vpack.c.bf16 %v272_v2, %v152_v1  ;;  %v282_v1 = vld [vmem:[#allocation6 + $0x510] sm:$0xff]  ;;  %v401_v2 = vld [vmem:[#allocation6 + $0x8c8] sm:$0xff] }
  0xc0   :  { %2025 = vmatmul.mubr.f32.vlgmr.msra.gmra.mrb[10].mxu0 %v722_v44  ;;  %v763_v44 = vrot.slane %v749_v34, %v6374_v17  ;;  %v158_v34 = vld [vmem:[#allocation6 + $0x130] sm:$0xff] }
  0xc1   :  { %5697 = vmatpush1.bf16.xpose.msra.mxu0 %v5696_v14  ;;  %2095 = vmatmul.mubr.f32.vlgmr.msra.gmra.mrb[10].mxu1 %v729_v47  ;;  %v5714_v47 = vpack.c.bf16 %v509_v40, %v389_v39  ;;  %v5738_v14 = vpack.c.bf16 %v515_v9, %v395_v8  ;;  %v399_v39 = vld [vmem:[#allocation6 + $0x8b8] sm:$0xff]  ;;  %v5752_v43 = vpack.c.bf16 %v278_v35, %v158_v34  ;;  %v525_v34 = vld [vmem:[#allocation6 + $0xca8] sm:$0xff] }
  0xc2   :  { %5705 = vmatpush1.bf16.xpose.msra.mxu1 %v5704_v15  ;;  %5699 = vmatprep.subr.bf16.mxu0 %v5698_v16  ;;  %v765_v50 = vcombine.high %v763_v44, %v763_v44  ;;  %v781_v15 = vcombine.high %v773_v7, %v773_v7  ;;  %v519_v40 = vld [vmem:[#allocation6 + $0xc78] sm:$0xff]  ;;  %v824_v35 = vrot.slane %v101_v24, %v6374_v17 }
  0xc3   :  { %5707 = vmatprep.subr.bf16.mxu1 %v5706_v18  ;;  %2164 = vmatprep.mubr.f32.mxu0 %v747_v19  ;;  %v392_v18 = vld [vmem:[#allocation6 + $0x880] sm:$0xff] }
  0xc4   :  { %2234 = vmatprep.mubr.f32.mxu1 %v748_v20  ;;  %v512_v19 = vld [vmem:[#allocation6 + $0xc40] sm:$0xff]  ;;  %v394_v20 = vld [vmem:[#allocation6 + $0x890] sm:$0xff] }
  0xc5   :  { %v5732_v26 = vpack.c.bf16 %v512_v19, %v392_v18  ;;  %v5740_v28 = vpack.c.bf16 %v514_v21, %v394_v20  ;;  %v522_v18 = vld [vmem:[#allocation6 + $0xc90] sm:$0xff]  ;;  %v165_v19 = vld [vmem:[#allocation6 + $0x168] sm:$0xff]  ;;  %v167_v21 = vld [vmem:[#allocation6 + $0x178] sm:$0xff] }
  0xc6   :  { %v285_v20 = vld [vmem:[#allocation6 + $0x528] sm:$0xff] }
  0xc9   :  { %5701 = vmatpush1.bf16.xpose.msra.mxu0 %v5700_v29  ;;  %v5742_v29 = vpack.c.bf16 %v277_v23, %v157_v22  ;;  %v287_v22 = vld [vmem:[#allocation6 + $0x538] sm:$0xff] }
  0xca   :  { %5709 = vmatpush1.bf16.xpose.msra.mxu1 %v5708_v31  ;;  %5711 = vmatprep.subr.bf16.mxu0 %v5710_v32  ;;  %v783_v31 = vcombine.high %v99_v27, %v99_v27  ;;  %v156_v32 = vld [vmem:[#allocation6 + $0x120] sm:$0xff]  ;;  %v5782_v27 = vpack.c.bf16 %v287_v22, %v167_v21  ;;  %v103_v21 = vld [vmem:[#allocation3 + $0x68] sm:$0xff] }
  0xcb   :  { %5719 = vmatprep.subr.bf16.mxu1 %v5718_v33  ;;  %v276_v33 = vld [vmem:[#allocation6 + $0x4e0] sm:$0xff] }
  0xcc   :  { %v5744_v42 = vpack.c.bf16 %v276_v33, %v156_v32  ;;  %v286_v32 = vld [vmem:[#allocation6 + $0x530] sm:$0xff]  ;;  %v405_v33 = vld [vmem:[#allocation6 + $0x8e8] sm:$0xff] }
  0xd0   :  { %2165 = vmatmul.mubr.f32.vlgmr.msra.gmra.mrb[12].mxu0 %v739_v10  ;;  %v780_v10 = vrot.slane %v766_v0, %v6374_v17  ;;  %v162_v0 = vld [vmem:[#allocation6 + $0x150] sm:$0xff] }
  0xd1   :  { %5713 = vmatpush1.bf16.xpose.msra.mxu0 %v5712_v45  ;;  %2235 = vmatmul.mubr.f32.vlgmr.msra.gmra.mrb[12].mxu1 %v746_v13  ;;  %v5730_v13 = vpack.c.bf16 %v513_v6, %v393_v5  ;;  %v5754_v45 = vpack.c.bf16 %v519_v40, %v399_v39  ;;  %v403_v5 = vld [vmem:[#allocation6 + $0x8d8] sm:$0xff]  ;;  %v5768_v9 = vpack.c.bf16 %v282_v1, %v162_v0  ;;  %v529_v0 = vld [vmem:[#allocation6 + $0xcc8] sm:$0xff] }
  0xd2   :  { %5721 = vmatpush1.bf16.xpose.msra.mxu1 %v5720_v46  ;;  %5715 = vmatprep.subr.bf16.mxu0 %v5714_v47  ;;  %v782_v16 = vcombine.high %v780_v10, %v780_v10  ;;  %v798_v46 = vcombine.high %v790_v38, %v790_v38  ;;  %v523_v6 = vld [vmem:[#allocation6 + $0xc98] sm:$0xff]  ;;  %v841_v1 = vrot.slane %v102_v54, %v6374_v17 }
  0xd3   :  { %5723 = vmatprep.subr.bf16.mxu1 %v5722_v48  ;;  %2304 = vmatprep.mubr.f32.mxu0 %v764_v49  ;;  %v396_v48 = vld [vmem:[#allocation6 + $0x8a0] sm:$0xff] }
  0xd4   :  { %2374 = vmatprep.mubr.f32.mxu1 %v765_v50  ;;  %v516_v49 = vld [vmem:[#allocation6 + $0xc60] sm:$0xff]  ;;  %v398_v50 = vld [vmem:[#allocation6 + $0x8b0] sm:$0xff] }
  0xd5   :  { %v5748_v56 = vpack.c.bf16 %v516_v49, %v396_v48  ;;  %v5756_v58 = vpack.c.bf16 %v518_v51, %v398_v50  ;;  %v526_v48 = vld [vmem:[#allocation6 + $0xcb0] sm:$0xff]  ;;  %v169_v49 = vld [vmem:[#allocation6 + $0x188] sm:$0xff]  ;;  %v171_v51 = vld [vmem:[#allocation6 + $0x198] sm:$0xff] }
  0xd6   :  { %v289_v50 = vld [vmem:[#allocation6 + $0x548] sm:$0xff] }
  0xd9   :  { %5717 = vmatpush1.bf16.xpose.msra.mxu0 %v5716_v59  ;;  %v5758_v59 = vpack.c.bf16 %v281_v53, %v161_v52  ;;  %v291_v52 = vld [vmem:[#allocation6 + $0x558] sm:$0xff] }
  0xda   :  { %5725 = vmatpush1.bf16.xpose.msra.mxu1 %v5724_v61  ;;  %5727 = vmatprep.subr.bf16.mxu0 %v5726_v62  ;;  %v800_v61 = vcombine.high %v100_v57, %v100_v57  ;;  %v160_v62 = vld [vmem:[#allocation6 + $0x140] sm:$0xff]  ;;  %v5798_v57 = vpack.c.bf16 %v291_v52, %v171_v51 }
  0xdb   :  { %5735 = vmatprep.subr.bf16.mxu1 %v5734_v63  ;;  %v280_v63 = vld [vmem:[#allocation6 + $0x500] sm:$0xff] }
  0xdc   :  { %v5760_v8 = vpack.c.bf16 %v280_v63, %v160_v62  ;;  %v290_v62 = vld [vmem:[#allocation6 + $0x550] sm:$0xff]  ;;  %v409_v63 = vld [vmem:[#allocation6 + $0x908] sm:$0xff]  ;;  %v104_v51 = vld [vmem:[#allocation3 + $0x70] sm:$0xff] }
  0xe0   :  { %2305 = vmatmul.mubr.f32.vlgmr.msra.gmra.mrb[14].mxu0 %v756_v41  ;;  %v797_v41 = vrot.slane %v783_v31, %v6374_v17  ;;  %v166_v31 = vld [vmem:[#allocation6 + $0x170] sm:$0xff] }
  0xe1   :  { %5729 = vmatpush1.bf16.xpose.msra.mxu0 %v5728_v11  ;;  %2375 = vmatmul.mubr.f32.vlgmr.msra.gmra.mrb[14].mxu1 %v763_v44  ;;  %v5746_v44 = vpack.c.bf16 %v517_v37, %v397_v36  ;;  %v5770_v11 = vpack.c.bf16 %v523_v6, %v403_v5  ;;  %v407_v36 = vld [vmem:[#allocation6 + $0x8f8] sm:$0xff]  ;;  %v5784_v40 = vpack.c.bf16 %v286_v32, %v166_v31  ;;  %v533_v31 = vld [vmem:[#allocation6 + $0xce8] sm:$0xff] }
  0xe2   :  { %5737 = vmatpush1.bf16.xpose.msra.mxu1 %v5736_v12  ;;  %5731 = vmatprep.subr.bf16.mxu0 %v5730_v13  ;;  %v799_v47 = vcombine.high %v797_v41, %v797_v41  ;;  %v815_v12 = vcombine.high %v807_v4, %v807_v4  ;;  %v527_v37 = vld [vmem:[#allocation6 + $0xcb8] sm:$0xff]  ;;  %v858_v32 = vrot.slane %v103_v21, %v6374_v17 }
  0xe3   :  { %5739 = vmatprep.subr.bf16.mxu1 %v5738_v14  ;;  %2444 = vmatprep.mubr.f32.mxu0 %v781_v15  ;;  %v400_v14 = vld [vmem:[#allocation6 + $0x8c0] sm:$0xff] }
  0xe4   :  { %2514 = vmatprep.mubr.f32.mxu1 %v782_v16  ;;  %v520_v15 = vld [vmem:[#allocation6 + $0xc80] sm:$0xff]  ;;  %v402_v16 = vld [vmem:[#allocation6 + $0x8d0] sm:$0xff] }
  0xe5   :  { %v5764_v23 = vpack.c.bf16 %v520_v15, %v400_v14  ;;  %v5772_v25 = vpack.c.bf16 %v522_v18, %v402_v16  ;;  %v530_v14 = vld [vmem:[#allocation6 + $0xcd0] sm:$0xff]  ;;  %v173_v15 = vld [vmem:[#allocation6 + $0x1a8] sm:$0xff]  ;;  %v175_v18 = vld [vmem:[#allocation6 + $0x1b8] sm:$0xff] }
  0xe6   :  { %v293_v16 = vld [vmem:[#allocation6 + $0x568] sm:$0xff] }
  0xe9   :  { %5733 = vmatpush1.bf16.xpose.msra.mxu0 %v5732_v26  ;;  %v5774_v26 = vpack.c.bf16 %v285_v20, %v165_v19  ;;  %v295_v19 = vld [vmem:[#allocation6 + $0x578] sm:$0xff] }
  0xea   :  { %5741 = vmatpush1.bf16.xpose.msra.mxu1 %v5740_v28  ;;  %5743 = vmatprep.subr.bf16.mxu0 %v5742_v29  ;;  %v817_v28 = vcombine.high %v101_v24, %v101_v24  ;;  %v164_v29 = vld [vmem:[#allocation6 + $0x160] sm:$0xff]  ;;  %v5814_v24 = vpack.c.bf16 %v295_v19, %v175_v18  ;;  %v183_v18 = vld [vmem:[#allocation6 + $0x1f8] sm:$0xff] }
  0xeb   :  { %5751 = vmatprep.subr.bf16.mxu1 %v5750_v30  ;;  %v284_v30 = vld [vmem:[#allocation6 + $0x520] sm:$0xff]  ;;  %v303_v19 = vld [vmem:[#allocation6 + $0x5b8] sm:$0xff] }
  0xec   :  { %v5776_v39 = vpack.c.bf16 %v284_v30, %v164_v29  ;;  %v294_v29 = vld [vmem:[#allocation6 + $0x570] sm:$0xff]  ;;  %v413_v30 = vld [vmem:[#allocation6 + $0x928] sm:$0xff] }
  0xf0   :  { %2445 = vmatmul.mubr.f32.vlgmr.msra.gmra.mrb[16].mxu0 %v773_v7  ;;  %v814_v7 = vrot.slane %v800_v61, %v6374_v17  ;;  %v170_v61 = vld [vmem:[#allocation6 + $0x190] sm:$0xff] }
  0xf1   :  { %5745 = vmatpush1.bf16.xpose.msra.mxu0 %v5744_v42  ;;  %2515 = vmatmul.mubr.f32.vlgmr.msra.gmra.mrb[16].mxu1 %v780_v10  ;;  %v5762_v10 = vpack.c.bf16 %v521_v3, %v401_v2  ;;  %v5786_v42 = vpack.c.bf16 %v527_v37, %v407_v36  ;;  %v411_v2 = vld [vmem:[#allocation6 + $0x918] sm:$0xff]  ;;  %v5800_v6 = vpack.c.bf16 %v290_v62, %v170_v61  ;;  %v537_v61 = vld [vmem:[#allocation6 + $0xd08] sm:$0xff] }
  0xf2   :  { %5753 = vmatpush1.bf16.xpose.msra.mxu1 %v5752_v43  ;;  %5747 = vmatprep.subr.bf16.mxu0 %v5746_v44  ;;  %v816_v13 = vcombine.high %v814_v7, %v814_v7  ;;  %v832_v43 = vcombine.high %v824_v35, %v824_v35  ;;  %v531_v3 = vld [vmem:[#allocation6 + $0xcd8] sm:$0xff]  ;;  %v875_v62 = vrot.slane %v104_v51, %v6374_v17 }
  0xf3   :  { %5755 = vmatprep.subr.bf16.mxu1 %v5754_v45  ;;  %2584 = vmatprep.mubr.f32.mxu0 %v798_v46  ;;  %v404_v45 = vld [vmem:[#allocation6 + $0x8e0] sm:$0xff] }
  0xf4   :  { %2654 = vmatprep.mubr.f32.mxu1 %v799_v47  ;;  %v524_v46 = vld [vmem:[#allocation6 + $0xca0] sm:$0xff]  ;;  %v406_v47 = vld [vmem:[#allocation6 + $0x8f0] sm:$0xff] }
  0xf5   :  { %v5780_v53 = vpack.c.bf16 %v524_v46, %v404_v45  ;;  %v5788_v55 = vpack.c.bf16 %v526_v48, %v406_v47  ;;  %v534_v45 = vld [vmem:[#allocation6 + $0xcf0] sm:$0xff]  ;;  %v177_v46 = vld [vmem:[#allocation6 + $0x1c8] sm:$0xff]  ;;  %v179_v48 = vld [vmem:[#allocation6 + $0x1d8] sm:$0xff] }
  0xf6   :  { %v297_v47 = vld [vmem:[#allocation6 + $0x588] sm:$0xff] }
  0xf9   :  { %5749 = vmatpush1.bf16.xpose.msra.mxu0 %v5748_v56  ;;  %v5790_v56 = vpack.c.bf16 %v289_v50, %v169_v49  ;;  %v299_v49 = vld [vmem:[#allocation6 + $0x598] sm:$0xff] }
  0xfa   :  { %5757 = vmatpush1.bf16.xpose.msra.mxu1 %v5756_v58  ;;  %5759 = vmatprep.subr.bf16.mxu0 %v5758_v59  ;;  %v834_v58 = vcombine.high %v102_v54, %v102_v54  ;;  %v168_v59 = vld [vmem:[#allocation6 + $0x180] sm:$0xff]  ;;  %v5830_v54 = vpack.c.bf16 %v299_v49, %v179_v48  ;;  %v542_v48 = vld [vmem:[#allocation6 + $0xd30] sm:$0xff]  ;;  %v185_v49 = vld [vmem:[#allocation6 + $0x208] sm:$0xff] }
  0xfb   :  { %5767 = vmatprep.subr.bf16.mxu1 %v5766_v60  ;;  %v288_v60 = vld [vmem:[#allocation6 + $0x540] sm:$0xff] }
  0xfc   :  { %v5792_v5 = vpack.c.bf16 %v288_v60, %v168_v59  ;;  %v298_v59 = vld [vmem:[#allocation6 + $0x590] sm:$0xff]  ;;  %v417_v60 = vld [vmem:[#allocation6 + $0x948] sm:$0xff] }
 0x100   :  { %2585 = vmatmul.mubr.f32.vlgmr.msra.gmra.mrb[18].mxu0 %v790_v38  ;;  %v831_v38 = vrot.slane %v817_v28, %v6374_v17  ;;  %v174_v28 = vld [vmem:[#allocation6 + $0x1b0] sm:$0xff] }
 0x101   :  { %5761 = vmatpush1.bf16.xpose.msra.mxu0 %v5760_v8  ;;  %2655 = vmatmul.mubr.f32.vlgmr.msra.gmra.mrb[18].mxu1 %v797_v41  ;;  %v5778_v41 = vpack.c.bf16 %v525_v34, %v405_v33  ;;  %v5802_v8 = vpack.c.bf16 %v531_v3, %v411_v2  ;;  %v415_v33 = vld [vmem:[#allocation6 + $0x938] sm:$0xff]  ;;  %v5816_v37 = vpack.c.bf16 %v294_v29, %v174_v28  ;;  %v180_v28 = vld [vmem:[#allocation6 + $0x1e0] sm:$0xff] }
 0x102   :  { %5769 = vmatpush1.bf16.xpose.msra.mxu1 %v5768_v9  ;;  %5763 = vmatprep.subr.bf16.mxu0 %v5762_v10  ;;  %v833_v44 = vcombine.high %v831_v38, %v831_v38  ;;  %v849_v9 = vcombine.high %v841_v1, %v841_v1  ;;  %v535_v34 = vld [vmem:[#allocation6 + $0xcf8] sm:$0xff]  ;;  %v300_v29 = vld [vmem:[#allocation6 + $0x5a0] sm:$0xff] }
 0x103   :  { %5771 = vmatprep.subr.bf16.mxu1 %v5770_v11  ;;  %2724 = vmatprep.mubr.f32.mxu0 %v815_v12  ;;  %v408_v11 = vld [vmem:[#allocation6 + $0x900] sm:$0xff] }
 0x104   :  { %2794 = vmatprep.mubr.f32.mxu1 %v816_v13  ;;  %v528_v12 = vld [vmem:[#allocation6 + $0xcc0] sm:$0xff]  ;;  %v410_v13 = vld [vmem:[#allocation6 + $0x910] sm:$0xff] }
 0x105   :  { %v5796_v20 = vpack.c.bf16 %v528_v12, %v408_v11  ;;  %v5804_v22 = vpack.c.bf16 %v530_v14, %v410_v13  ;;  %v538_v12 = vld [vmem:[#allocation6 + $0xd10] sm:$0xff]  ;;  %v181_v13 = vld [vmem:[#allocation6 + $0x1e8] sm:$0xff] }
 0x106   :  { %v301_v14 = vld [vmem:[#allocation6 + $0x5a8] sm:$0xff] }
 0x109   :  { %5765 = vmatpush1.bf16.xpose.msra.mxu0 %v5764_v23  ;;  %v5806_v23 = vpack.c.bf16 %v293_v16, %v173_v15 }
 0x10a   :  { %5773 = vmatpush1.bf16.xpose.msra.mxu1 %v5772_v25  ;;  %5775 = vmatprep.subr.bf16.mxu0 %v5774_v26  ;;  %v851_v25 = vcombine.high %v103_v21, %v103_v21  ;;  %v172_v26 = vld [vmem:[#allocation6 + $0x1a0] sm:$0xff] }
 0x10b   :  { %5783 = vmatprep.subr.bf16.mxu1 %v5782_v27  ;;  %v292_v27 = vld [vmem:[#allocation6 + $0x560] sm:$0xff] }
 0x10c   :  { %v5808_v36 = vpack.c.bf16 %v292_v27, %v172_v26  ;;  %v5846_v26 = vpack.c.bf16 %v303_v19, %v183_v18  ;;  %v544_v18 = vld [vmem:[#allocation6 + $0xd40] sm:$0xff]  ;;  %v426_v19 = vld [vmem:[#allocation6 + $0x990] sm:$0xff] }
 0x110   :  { %2725 = vmatmul.mubr.f32.vlgmr.msra.gmra.mrb[20].mxu0 %v807_v4  ;;  %v848_v4 = vrot.slane %v834_v58, %v6374_v17  ;;  %v178_v58 = vld [vmem:[#allocation6 + $0x1d0] sm:$0xff] }
 0x111   :  { %5777 = vmatpush1.bf16.xpose.msra.mxu0 %v5776_v39  ;;  %2795 = vmatmul.mubr.f32.vlgmr.msra.gmra.mrb[20].mxu1 %v814_v7  ;;  %v5794_v7 = vpack.c.bf16 %v529_v0, %v409_v63  ;;  %v5818_v39 = vpack.c.bf16 %v535_v34, %v415_v33  ;;  %v419_v63 = vld [vmem:[#allocation6 + $0x958] sm:$0xff]  ;;  %v5832_v3 = vpack.c.bf16 %v298_v59, %v178_v58  ;;  %v541_v33 = vld [vmem:[#allocation6 + $0xd28] sm:$0xff]  ;;  %v106_v58 = vld [vmem:[#allocation3 + $0x80] sm:$0xff] }
 0x112   :  { %5785 = vmatpush1.bf16.xpose.msra.mxu1 %v5784_v40  ;;  %5779 = vmatprep.subr.bf16.mxu0 %v5778_v41  ;;  %v850_v10 = vcombine.high %v848_v4, %v848_v4  ;;  %v866_v40 = vcombine.high %v858_v32, %v858_v32  ;;  %v539_v0 = vld [vmem:[#allocation6 + $0xd18] sm:$0xff] }
 0x113   :  { %5787 = vmatprep.subr.bf16.mxu1 %v5786_v42  ;;  %2864 = vmatprep.mubr.f32.mxu0 %v832_v43  ;;  %v412_v42 = vld [vmem:[#allocation6 + $0x920] sm:$0xff] }
 0x114   :  { %2934 = vmatprep.mubr.f32.mxu1 %v833_v44  ;;  %v532_v43 = vld [vmem:[#allocation6 + $0xce0] sm:$0xff]  ;;  %v414_v44 = vld [vmem:[#allocation6 + $0x930] sm:$0xff] }
 0x115   :  { %v5812_v50 = vpack.c.bf16 %v532_v43, %v412_v42  ;;  %v5820_v52 = vpack.c.bf16 %v534_v45, %v414_v44  ;;  %v420_v44 = vld [vmem:[#allocation6 + $0x960] sm:$0xff] }
 0x116   :  { %v540_v45 = vld [vmem:[#allocation6 + $0xd20] sm:$0xff] }
 0x119   :  { %5781 = vmatpush1.bf16.xpose.msra.mxu0 %v5780_v53  ;;  %v5822_v53 = vpack.c.bf16 %v297_v47, %v177_v46  ;;  %v422_v46 = vld [vmem:[#allocation6 + $0x970] sm:$0xff] }
 0x11a   :  { %5789 = vmatpush1.bf16.xpose.msra.mxu1 %v5788_v55  ;;  %5791 = vmatprep.subr.bf16.mxu0 %v5790_v56  ;;  %v868_v55 = vcombine.high %v104_v51, %v104_v51  ;;  %v176_v56 = vld [vmem:[#allocation6 + $0x1c0] sm:$0xff] }
 0x11b   :  { %5799 = vmatprep.subr.bf16.mxu1 %v5798_v57  ;;  %v296_v57 = vld [vmem:[#allocation6 + $0x580] sm:$0xff] }
 0x11c   :  { %v5824_v2 = vpack.c.bf16 %v296_v57, %v176_v56  ;;  %v5844_v57 = vpack.c.bf16 %v540_v45, %v420_v44  ;;  %v431_v44 = vld [vmem:[#allocation6 + $0x9b8] sm:$0xff] }
 0x11d   :  { %v551_v45 = vld [vmem:[#allocation6 + $0xd78] sm:$0xff] }
 0x120   :  { %2865 = vmatmul.mubr.f32.vlgmr.msra.gmra.mrb[22].mxu0 %v824_v35  ;;  %v865_v35 = vrot.slane %v851_v25, %v6374_v17  ;;  %v5838_v25 = vpack.c.bf16 %v301_v14, %v181_v13 }
 0x121   :  { %5793 = vmatpush1.bf16.xpose.msra.mxu0 %v5792_v5  ;;  %2935 = vmatmul.mubr.f32.vlgmr.msra.gmra.mrb[22].mxu1 %v831_v38  ;;  %v5810_v38 = vpack.c.bf16 %v533_v31, %v413_v30  ;;  %v5834_v5 = vpack.c.bf16 %v539_v0, %v419_v63  ;;  %v182_v30 = vld [vmem:[#allocation6 + $0x1f0] sm:$0xff]  ;;  %v902_v63 = vcombine.high %v106_v58, %v106_v58  ;;  %v184_v0 = vld [vmem:[#allocation6 + $0x200] sm:$0xff] }
 0x122   :  { %5801 = vmatpush1.bf16.xpose.msra.mxu1 %v5800_v6  ;;  %5795 = vmatprep.subr.bf16.mxu0 %v5794_v7  ;;  %v867_v41 = vcombine.high %v865_v35, %v865_v35  ;;  %v883_v6 = vcombine.high %v875_v62, %v875_v62  ;;  %v302_v31 = vld [vmem:[#allocation6 + $0x5b0] sm:$0xff] }
 0x123   :  { %5803 = vmatprep.subr.bf16.mxu1 %v5802_v8  ;;  %3004 = vmatprep.mubr.f32.mxu0 %v849_v9  ;;  %v416_v8 = vld [vmem:[#allocation6 + $0x940] sm:$0xff] }
 0x124   :  { %3074 = vmatprep.mubr.f32.mxu1 %v850_v10  ;;  %v536_v9 = vld [vmem:[#allocation6 + $0xd00] sm:$0xff]  ;;  %v418_v10 = vld [vmem:[#allocation6 + $0x950] sm:$0xff] }
 0x129   :  { %5797 = vmatpush1.bf16.xpose.msra.mxu0 %v5796_v20 }
 0x12a   :  { %5805 = vmatpush1.bf16.xpose.msra.mxu1 %v5804_v22  ;;  %5807 = vmatprep.subr.bf16.mxu0 %v5806_v23  ;;  %v5828_v22 = vpack.c.bf16 %v536_v9, %v416_v8  ;;  %v105_v23 = vld [vmem:[#allocation3 + $0x78] sm:$0xff]  ;;  %v547_v8 = vld [vmem:[#allocation6 + $0xd58] sm:$0xff]  ;;  %v916_v9 = vrot.slane %v902_v63, %v6374_v17 }
 0x12b   :  { %5815 = vmatprep.subr.bf16.mxu1 %v5814_v24  ;;  %v5836_v24 = vpack.c.bf16 %v538_v12, %v418_v10  ;;  %v885_v27 = vcombine.high %v105_v23, %v105_v23  ;;  %v892_v34 = vrot.slane %v105_v23, %v6374_v17  ;;  %v309_v23 = vld [vmem:[#allocation6 + $0x5e8] sm:$0xff]  ;;  %v195_v63 = vld [vmem:[#allocation6 + $0x258] sm:$0xff] }
 0x12d   :  { %v900_v42 = vcombine.high %v892_v34, %v892_v34 }
 0x130   :  { %3005 = vmatmul.mubr.f32.vlgmr.msra.gmra.mrb[24].mxu0 %v841_v1  ;;  %v882_v1 = vrot.slane %v868_v55, %v6374_v17  ;;  %v307_v55 = vld [vmem:[#allocation6 + $0x5d8] sm:$0xff] }
 0x131   :  { %5809 = vmatpush1.bf16.xpose.msra.mxu0 %v5808_v36  ;;  %3075 = vmatmul.mubr.f32.vlgmr.msra.gmra.mrb[24].mxu1 %v848_v4  ;;  %v5826_v4 = vpack.c.bf16 %v537_v61, %v417_v60  ;;  %v543_v36 = vld [vmem:[#allocation6 + $0xd38] sm:$0xff]  ;;  %v5852_v60 = vpack.c.bf16 %v542_v48, %v422_v46 }
 0x132   :  { %5817 = vmatpush1.bf16.xpose.msra.mxu1 %v5816_v37  ;;  %5811 = vmatprep.subr.bf16.mxu0 %v5810_v38  ;;  %v884_v7 = vcombine.high %v882_v1, %v882_v1  ;;  %v899_v37 = vrot.slane %v885_v27, %v6374_v17  ;;  %v5840_v38 = vpack.c.bf16 %v300_v29, %v180_v28  ;;  %v191_v27 = vld [vmem:[#allocation6 + $0x238] sm:$0xff] }
 0x133   :  { %5819 = vmatprep.subr.bf16.mxu1 %v5818_v39  ;;  %3144 = vmatprep.mubr.f32.mxu0 %v866_v40  ;;  %v5848_v39 = vpack.c.bf16 %v302_v31, %v182_v30  ;;  %v311_v28 = vld [vmem:[#allocation6 + $0x5f8] sm:$0xff] }
 0x134   :  { %3214 = vmatprep.mubr.f32.mxu1 %v867_v41  ;;  %v901_v43 = vcombine.high %v899_v37, %v899_v37  ;;  %v107_v31 = vld [vmem:[#allocation3 + $0x88] sm:$0xff] }
 0x139   :  { %5813 = vmatpush1.bf16.xpose.msra.mxu0 %v5812_v50  ;;  %v305_v50 = vld [vmem:[#allocation6 + $0x5c8] sm:$0xff] }
 0x13a   :  { %5821 = vmatpush1.bf16.xpose.msra.mxu1 %v5820_v52  ;;  %5823 = vmatprep.subr.bf16.mxu0 %v5822_v53  ;;  %v5854_v61 = vpack.c.bf16 %v305_v50, %v185_v49  ;;  %v5882_v50 = vpack.c.bf16 %v551_v45, %v431_v44 }
 0x13b   :  { %5831 = vmatprep.subr.bf16.mxu1 %v5830_v54  ;;  %v187_v54 = vld [vmem:[#allocation6 + $0x218] sm:$0xff] }
 0x140   :  { %3145 = vmatmul.mubr.f32.vlgmr.msra.gmra.mrb[26].mxu0 %v858_v32  ;;  %v421_v32 = vld [vmem:[#allocation6 + $0x968] sm:$0xff] }
 0x141   :  { %5825 = vmatpush1.bf16.xpose.msra.mxu0 %v5824_v2  ;;  %3215 = vmatmul.mubr.f32.vlgmr.msra.gmra.mrb[26].mxu1 %v865_v35  ;;  %v423_v35 = vld [vmem:[#allocation6 + $0x978] sm:$0xff]  ;;  %v5842_v40 = vpack.c.bf16 %v541_v33, %v421_v32  ;;  %v186_v2 = vld [vmem:[#allocation6 + $0x210] sm:$0xff] }
 0x142   :  { %5833 = vmatpush1.bf16.xpose.msra.mxu1 %v5832_v3  ;;  %5827 = vmatprep.subr.bf16.mxu0 %v5826_v4  ;;  %v5850_v41 = vpack.c.bf16 %v543_v36, %v423_v35  ;;  %v306_v3 = vld [vmem:[#allocation6 + $0x5d0] sm:$0xff]  ;;  %v425_v4 = vld [vmem:[#allocation6 + $0x988] sm:$0xff]  ;;  %v5878_v35 = vpack.c.bf16 %v311_v28, %v191_v27  ;;  %v919_v36 = vcombine.high %v107_v31, %v107_v31  ;;  %v552_v27 = vld [vmem:[#allocation6 + $0xd80] sm:$0xff] }
 0x143   :  { %v1326_v11 = vpop.f32.mrb[0].mxu0  ;;  %5835 = vmatprep.subr.bf16.mxu1 %v5834_v5  ;;  %3284 = vmatprep.mubr.f32.mxu0 %v883_v6  ;;  %v545_v5 = vld [vmem:[#allocation6 + $0xd48] sm:$0xff]  ;;  %v909_v6 = vrot.slane %v106_v58, %v6374_v17  ;;  %v434_v28 = vld [vmem:[#allocation6 + $0x9d0] sm:$0xff] }
 0x144   :  { %v1328_v15 = vpop.f32.mrb[1].mxu0  ;;  %v1396_v16 = vpop.f32.mrb[0].mxu1  ;;  %3354 = vmatprep.mubr.f32.mxu1 %v884_v7  ;;  %v427_v7 = vld [vmem:[#allocation6 + $0x998] sm:$0xff]  ;;  %v5858_v12 = vpack.c.bf16 %v545_v5, %v425_v4  ;;  %v933_v46 = vrot.slane %v919_v36, %v6374_v17  ;;  %v193_v58 = vld [vmem:[#allocation6 + $0x248] sm:$0xff] }
 0x145   :  { %v1397_v20 = vadd.f32 %v1396_v16, %v1326_v11  ;;  %v1398_v21 = vpop.f32.mrb[1].mxu1  ;;  %v5864_v11 = vpack.c.bf16 %v306_v3, %v186_v2  ;;  %v5866_v13 = vpack.c.bf16 %v547_v8, %v427_v7  ;;  %v917_v14 = vcombine.high %v909_v6, %v909_v6  ;;  %v424_v16 = vld [vmem:[#allocation6 + $0x980] sm:$0xff]  ;;  %v199_v36 = vld [vmem:[#allocation6 + $0x278] sm:$0xff] }
 0x146   :  { %v918_v15 = vcombine.high %v916_v9, %v916_v9  ;;  %v546_v21 = vld [vmem:[#allocation6 + $0xd50] sm:$0xff]  ;;  %v5860_v30 = vpack.c.bf16 %v544_v18, %v424_v16  ;;  %v108_v3 = vld [vmem:[#allocation3 + $0x90] sm:$0xff]  ;;  %v435_v16 = vld [vmem:[#allocation6 + $0x9d8] sm:$0xff] }
 0x147   :  { %v5868_v33 = vpack.c.bf16 %v546_v21, %v426_v19  ;;  %v936_v8 = vcombine.high %v108_v3, %v108_v3  ;;  %v555_v18 = vld [vmem:[#allocation6 + $0xd98] sm:$0xff] }
 0x149   :  { %5829 = vmatpush1.bf16.xpose.msra.mxu0 %v5828_v22  ;;  %v189_v22 = vld [vmem:[#allocation6 + $0x228] sm:$0xff]  ;;  %v950_v19 = vrot.slane %v936_v8, %v6374_v17  ;;  %v203_v8 = vld [vmem:[#allocation6 + $0x298] sm:$0xff] }
 0x14a   :  { %5837 = vmatpush1.bf16.xpose.msra.mxu1 %v5836_v24  ;;  %5839 = vmatprep.subr.bf16.mxu0 %v5838_v25 }
 0x14b   :  { %5847 = vmatprep.subr.bf16.mxu1 %v5846_v26 }
 0x150   :  { %3285 = vmatmul.mubr.f32.vlgmr.msra.gmra.mrb[28].mxu0 %v875_v62  ;;  %v5862_v62 = vpack.c.bf16 %v307_v55, %v187_v54  ;;  %v548_v54 = vld [vmem:[#allocation6 + $0xd60] sm:$0xff]  ;;  %v430_v55 = vld [vmem:[#allocation6 + $0x9b0] sm:$0xff] }
 0x151   :  { %5841 = vmatpush1.bf16.xpose.msra.mxu0 %v5840_v38  ;;  %3355 = vmatmul.mubr.f32.vlgmr.msra.gmra.mrb[28].mxu1 %v882_v1  ;;  %v304_v1 = vld [vmem:[#allocation6 + $0x5c0] sm:$0xff] }
 0x152   :  { %5849 = vmatpush1.bf16.xpose.msra.mxu1 %v5848_v39  ;;  %5843 = vmatprep.subr.bf16.mxu0 %v5842_v40  ;;  %v5856_v10 = vpack.c.bf16 %v304_v1, %v184_v0  ;;  %v308_v38 = vld [vmem:[#allocation6 + $0x5e0] sm:$0xff]  ;;  %v190_v39 = vld [vmem:[#allocation6 + $0x230] sm:$0xff]  ;;  %v315_v0 = vld [vmem:[#allocation6 + $0x618] sm:$0xff] }
 0x153   :  { %v1466_v47 = vpop.f32.mrb[2].mxu0  ;;  %5851 = vmatprep.subr.bf16.mxu1 %v5850_v41  ;;  %3424 = vmatprep.mubr.f32.mxu0 %v900_v42  ;;  %v310_v40 = vld [vmem:[#allocation6 + $0x5f0] sm:$0xff]  ;;  %v429_v41 = vld [vmem:[#allocation6 + $0x9a8] sm:$0xff]  ;;  %v5894_v7 = vpack.c.bf16 %v315_v0, %v195_v63  ;;  %v556_v63 = vld [vmem:[#allocation6 + $0xda0] sm:$0xff] }
 0x154   :  { %v1467_v51 = vadd.f32 %v1466_v47, %v1397_v20  ;;  %v1468_v52 = vpop.f32.mrb[3].mxu0  ;;  %v1536_v53 = vpop.f32.mrb[2].mxu1  ;;  %3494 = vmatprep.mubr.f32.mxu1 %v901_v43  ;;  %v549_v42 = vld [vmem:[#allocation6 + $0xd68] sm:$0xff]  ;;  %v926_v43 = vrot.slane %v107_v31, %v6374_v17  ;;  %v5880_v48 = vpack.c.bf16 %v310_v40, %v190_v39  ;;  %v438_v0 = vld [vmem:[#allocation6 + $0x9f0] sm:$0xff] }
 0x155   :  { %v1538_v56 = vpop.f32.mrb[3].mxu1  ;;  %v5874_v49 = vpack.c.bf16 %v549_v42, %v429_v41  ;;  %v935_v52 = vcombine.high %v933_v46, %v933_v46  ;;  %v197_v31 = vld [vmem:[#allocation6 + $0x268] sm:$0xff] }
 0x156   :  { %v1537_v59 = vadd.f32 %v1536_v53, %v1467_v51  ;;  %v934_v51 = vcombine.high %v926_v43, %v926_v43  ;;  %v428_v53 = vld [vmem:[#allocation6 + $0x9a0] sm:$0xff]  ;;  %v109_v40 = vld [vmem:[#allocation3 + $0x98] sm:$0xff] }
 0x157   :  { %v5876_v2 = vpack.c.bf16 %v548_v54, %v428_v53  ;;  %v953_v45 = vcombine.high %v109_v40, %v109_v40  ;;  %v439_v53 = vld [vmem:[#allocation6 + $0x9f8] sm:$0xff] }
 0x158   :  { %v559_v54 = vld [vmem:[#allocation6 + $0xdb8] sm:$0xff] }
 0x159   :  { %5845 = vmatpush1.bf16.xpose.msra.mxu0 %v5844_v57  ;;  %v550_v57 = vld [vmem:[#allocation6 + $0xd70] sm:$0xff] }
 0x15a   :  { %5853 = vmatpush1.bf16.xpose.msra.mxu1 %v5852_v60  ;;  %5855 = vmatprep.subr.bf16.mxu0 %v5854_v61  ;;  %v5884_v5 = vpack.c.bf16 %v550_v57, %v430_v55  ;;  %v967_v55 = vrot.slane %v953_v45, %v6374_v17  ;;  %v207_v45 = vld [vmem:[#allocation6 + $0x2b8] sm:$0xff] }
 0x15b   :  { %5863 = vmatprep.subr.bf16.mxu1 %v5862_v62 }
 0x160   :  { %3425 = vmatmul.mubr.f32.vlgmr.msra.gmra.mrb[30].mxu0 %v892_v34  ;;  %v5870_v34 = vpack.c.bf16 %v309_v23, %v189_v22  ;;  %v5898_v23 = vpack.c.bf16 %v555_v18, %v435_v16 }
 0x161   :  { %5857 = vmatpush1.bf16.xpose.msra.mxu0 %v5856_v10  ;;  %3495 = vmatmul.mubr.f32.vlgmr.msra.gmra.mrb[30].mxu1 %v899_v37  ;;  %v188_v37 = vld [vmem:[#allocation6 + $0x220] sm:$0xff] }
 0x162   :  { %5865 = vmatpush1.bf16.xpose.msra.mxu1 %v5864_v11  ;;  %5859 = vmatprep.subr.bf16.mxu0 %v5858_v12  ;;  %v5872_v47 = vpack.c.bf16 %v308_v38, %v188_v37  ;;  %v312_v10 = vld [vmem:[#allocation6 + $0x600] sm:$0xff]  ;;  %v194_v11 = vld [vmem:[#allocation6 + $0x250] sm:$0xff]  ;;  %v319_v37 = vld [vmem:[#allocation6 + $0x638] sm:$0xff] }
 0x163   :  { %v1606_v20 = vpop.f32.mrb[4].mxu0  ;;  %5867 = vmatprep.subr.bf16.mxu1 %v5866_v13  ;;  %3564 = vmatprep.mubr.f32.mxu0 %v917_v14  ;;  %v314_v12 = vld [vmem:[#allocation6 + $0x610] sm:$0xff]  ;;  %v433_v13 = vld [vmem:[#allocation6 + $0x9c8] sm:$0xff]  ;;  %v5910_v44 = vpack.c.bf16 %v319_v37, %v199_v36  ;;  %v560_v36 = vld [vmem:[#allocation6 + $0xdc0] sm:$0xff] }
 0x164   :  { %v1607_v24 = vadd.f32 %v1606_v20, %v1537_v59  ;;  %v1608_v25 = vpop.f32.mrb[5].mxu0  ;;  %v1676_v26 = vpop.f32.mrb[4].mxu1  ;;  %3634 = vmatprep.mubr.f32.mxu1 %v918_v15  ;;  %v313_v59 = vld [vmem:[#allocation6 + $0x608] sm:$0xff]  ;;  %v943_v15 = vrot.slane %v108_v3, %v6374_v17  ;;  %v5896_v21 = vpack.c.bf16 %v314_v12, %v194_v11  ;;  %v110_v12 = vld [vmem:[#allocation3 + $0xa0] sm:$0xff] }
 0x165   :  { %v1678_v29 = vpop.f32.mrb[5].mxu1  ;;  %v553_v14 = vld [vmem:[#allocation6 + $0xd88] sm:$0xff]  ;;  %v952_v25 = vcombine.high %v950_v19, %v950_v19  ;;  %v970_v18 = vcombine.high %v110_v12, %v110_v12  ;;  %v442_v37 = vld [vmem:[#allocation6 + $0xa10] sm:$0xff] }
 0x166   :  { %v1677_v32 = vadd.f32 %v1676_v26, %v1607_v24  ;;  %v5890_v22 = vpack.c.bf16 %v553_v14, %v433_v13  ;;  %v951_v24 = vcombine.high %v943_v15, %v943_v15  ;;  %v432_v26 = vld [vmem:[#allocation6 + $0x9c0] sm:$0xff]  ;;  %v201_v3 = vld [vmem:[#allocation6 + $0x288] sm:$0xff] }
 0x167   :  { %v5892_v39 = vpack.c.bf16 %v552_v27, %v432_v26  ;;  %v443_v26 = vld [vmem:[#allocation6 + $0xa18] sm:$0xff] }
 0x168   :  { %v563_v27 = vld [vmem:[#allocation6 + $0xdd8] sm:$0xff] }
 0x169   :  { %5861 = vmatpush1.bf16.xpose.msra.mxu0 %v5860_v30  ;;  %v554_v30 = vld [vmem:[#allocation6 + $0xd90] sm:$0xff] }
 0x16a   :  { %5869 = vmatpush1.bf16.xpose.msra.mxu1 %v5868_v33  ;;  %5871 = vmatprep.subr.bf16.mxu0 %v5870_v34  ;;  %v5900_v42 = vpack.c.bf16 %v554_v30, %v434_v28  ;;  %v984_v28 = vrot.slane %v970_v18, %v6374_v17  ;;  %v211_v18 = vld [vmem:[#allocation6 + $0x2d8] sm:$0xff] }
 0x16b   :  { %5879 = vmatprep.subr.bf16.mxu1 %v5878_v35 }
 0x170   :  { %3565 = vmatmul.mubr.f32.vlgmr.msra.gmra.mrb[32].mxu0 %v909_v6  ;;  %v5886_v6 = vpack.c.bf16 %v313_v59, %v193_v58  ;;  %v5914_v59 = vpack.c.bf16 %v559_v54, %v439_v53 }
 0x171   :  { %5873 = vmatpush1.bf16.xpose.msra.mxu0 %v5872_v47  ;;  %3635 = vmatmul.mubr.f32.vlgmr.msra.gmra.mrb[32].mxu1 %v916_v9  ;;  %v192_v9 = vld [vmem:[#allocation6 + $0x240] sm:$0xff] }
 0x172   :  { %5881 = vmatpush1.bf16.xpose.msra.mxu1 %v5880_v48  ;;  %5875 = vmatprep.subr.bf16.mxu0 %v5874_v49  ;;  %v5888_v20 = vpack.c.bf16 %v312_v10, %v192_v9  ;;  %v316_v47 = vld [vmem:[#allocation6 + $0x620] sm:$0xff]  ;;  %v198_v48 = vld [vmem:[#allocation6 + $0x270] sm:$0xff]  ;;  %v323_v9 = vld [vmem:[#allocation6 + $0x658] sm:$0xff] }
 0x173   :  { %v1746_v56 = vpop.f32.mrb[6].mxu0  ;;  %5883 = vmatprep.subr.bf16.mxu1 %v5882_v50  ;;  %3704 = vmatprep.mubr.f32.mxu0 %v934_v51  ;;  %v318_v49 = vld [vmem:[#allocation6 + $0x630] sm:$0xff]  ;;  %v437_v50 = vld [vmem:[#allocation6 + $0x9e8] sm:$0xff]  ;;  %v5926_v16 = vpack.c.bf16 %v323_v9, %v203_v8  ;;  %v564_v8 = vld [vmem:[#allocation6 + $0xde0] sm:$0xff] }
 0x174   :  { %v1747_v60 = vadd.f32 %v1746_v56, %v1677_v32  ;;  %v1748_v61 = vpop.f32.mrb[7].mxu0  ;;  %v1816_v62 = vpop.f32.mrb[6].mxu1  ;;  %3774 = vmatprep.mubr.f32.mxu1 %v935_v52  ;;  %v317_v32 = vld [vmem:[#allocation6 + $0x628] sm:$0xff]  ;;  %v960_v52 = vrot.slane %v109_v40, %v6374_v17  ;;  %v5912_v57 = vpack.c.bf16 %v318_v49, %v198_v48  ;;  %v111_v49 = vld [vmem:[#allocation3 + $0xa8] sm:$0xff]  ;;  %v446_v9 = vld [vmem:[#allocation6 + $0xa30] sm:$0xff] }
 0x175   :  { %v1818_v1 = vpop.f32.mrb[7].mxu1  ;;  %v557_v51 = vld [vmem:[#allocation6 + $0xda8] sm:$0xff]  ;;  %v969_v61 = vcombine.high %v967_v55, %v967_v55  ;;  %v987_v54 = vcombine.high %v111_v49, %v111_v49 }
 0x176   :  { %v1817_v4 = vadd.f32 %v1816_v62, %v1747_v60  ;;  %v5906_v58 = vpack.c.bf16 %v557_v51, %v437_v50  ;;  %v968_v60 = vcombine.high %v960_v52, %v960_v52  ;;  %v436_v62 = vld [vmem:[#allocation6 + $0x9e0] sm:$0xff]  ;;  %v205_v40 = vld [vmem:[#allocation6 + $0x2a8] sm:$0xff] }
 0x177   :  { %v5908_v11 = vpack.c.bf16 %v556_v63, %v436_v62  ;;  %v447_v62 = vld [vmem:[#allocation6 + $0xa38] sm:$0xff] }
 0x178   :  { %v567_v63 = vld [vmem:[#allocation6 + $0xdf8] sm:$0xff] }
 0x179   :  { %5877 = vmatpush1.bf16.xpose.msra.mxu0 %v5876_v2  ;;  %v558_v2 = vld [vmem:[#allocation6 + $0xdb0] sm:$0xff] }
 0x17a   :  { %5885 = vmatpush1.bf16.xpose.msra.mxu1 %v5884_v5  ;;  %5887 = vmatprep.subr.bf16.mxu0 %v5886_v6  ;;  %v5916_v14 = vpack.c.bf16 %v558_v2, %v438_v0  ;;  %v1001_v0 = vrot.slane %v987_v54, %v6374_v17  ;;  %v215_v54 = vld [vmem:[#allocation6 + $0x2f8] sm:$0xff] }
 0x17b   :  { %5895 = vmatprep.subr.bf16.mxu1 %v5894_v7 }
 0x180   :  { %3705 = vmatmul.mubr.f32.vlgmr.msra.gmra.mrb[34].mxu0 %v926_v43  ;;  %v5902_v43 = vpack.c.bf16 %v317_v32, %v197_v31  ;;  %v5930_v32 = vpack.c.bf16 %v563_v27, %v443_v26 }
 0x181   :  { %5889 = vmatpush1.bf16.xpose.msra.mxu0 %v5888_v20  ;;  %3775 = vmatmul.mubr.f32.vlgmr.msra.gmra.mrb[34].mxu1 %v933_v46  ;;  %v196_v46 = vld [vmem:[#allocation6 + $0x260] sm:$0xff] }
 0x182   :  { %5897 = vmatpush1.bf16.xpose.msra.mxu1 %v5896_v21  ;;  %5891 = vmatprep.subr.bf16.mxu0 %v5890_v22  ;;  %v5904_v56 = vpack.c.bf16 %v316_v47, %v196_v46  ;;  %v320_v20 = vld [vmem:[#allocation6 + $0x640] sm:$0xff]  ;;  %v202_v21 = vld [vmem:[#allocation6 + $0x290] sm:$0xff]  ;;  %v327_v46 = vld [vmem:[#allocation6 + $0x678] sm:$0xff] }
 0x183   :  { %v1886_v29 = vpop.f32.mrb[8].mxu0  ;;  %5899 = vmatprep.subr.bf16.mxu1 %v5898_v23  ;;  %3844 = vmatprep.mubr.f32.mxu0 %v951_v24  ;;  %v322_v22 = vld [vmem:[#allocation6 + $0x650] sm:$0xff]  ;;  %v441_v23 = vld [vmem:[#allocation6 + $0xa08] sm:$0xff]  ;;  %v5942_v53 = vpack.c.bf16 %v327_v46, %v207_v45  ;;  %v568_v45 = vld [vmem:[#allocation6 + $0xe00] sm:$0xff] }
 0x184   :  { %v1887_v33 = vadd.f32 %v1886_v29, %v1817_v4  ;;  %v1888_v34 = vpop.f32.mrb[9].mxu0  ;;  %v1956_v35 = vpop.f32.mrb[8].mxu1  ;;  %3914 = vmatprep.mubr.f32.mxu1 %v952_v25  ;;  %v321_v4 = vld [vmem:[#allocation6 + $0x648] sm:$0xff]  ;;  %v977_v25 = vrot.slane %v110_v12, %v6374_v17  ;;  %v5928_v30 = vpack.c.bf16 %v322_v22, %v202_v21  ;;  %v112_v22 = vld [vmem:[#allocation3 + $0xb0] sm:$0xff]  ;;  %v450_v46 = vld [vmem:[#allocation6 + $0xa50] sm:$0xff] }
 0x185   :  { %v1958_v38 = vpop.f32.mrb[9].mxu1  ;;  %v561_v24 = vld [vmem:[#allocation6 + $0xdc8] sm:$0xff]  ;;  %v986_v34 = vcombine.high %v984_v28, %v984_v28  ;;  %v1004_v27 = vcombine.high %v112_v22, %v112_v22 }
 0x186   :  { %v1957_v41 = vadd.f32 %v1956_v35, %v1887_v33  ;;  %v5922_v31 = vpack.c.bf16 %v561_v24, %v441_v23  ;;  %v985_v33 = vcombine.high %v977_v25, %v977_v25  ;;  %v440_v35 = vld [vmem:[#allocation6 + $0xa00] sm:$0xff]  ;;  %v209_v12 = vld [vmem:[#allocation6 + $0x2c8] sm:$0xff] }
 0x187   :  { %v5924_v48 = vpack.c.bf16 %v560_v36, %v440_v35  ;;  %v451_v35 = vld [vmem:[#allocation6 + $0xa58] sm:$0xff] }
 0x188   :  { %v571_v36 = vld [vmem:[#allocation6 + $0xe18] sm:$0xff] }
 0x189   :  { %5893 = vmatpush1.bf16.xpose.msra.mxu0 %v5892_v39  ;;  %v562_v39 = vld [vmem:[#allocation6 + $0xdd0] sm:$0xff] }
 0x18a   :  { %5901 = vmatpush1.bf16.xpose.msra.mxu1 %v5900_v42  ;;  %5903 = vmatprep.subr.bf16.mxu0 %v5902_v43  ;;  %v5932_v51 = vpack.c.bf16 %v562_v39, %v442_v37  ;;  %v1018_v37 = vrot.slane %v1004_v27, %v6374_v17  ;;  %v219_v27 = vld [vmem:[#allocation6 + $0x318] sm:$0xff] }
 0x18b   :  { %5911 = vmatprep.subr.bf16.mxu1 %v5910_v44 }
 0x190   :  { %3845 = vmatmul.mubr.f32.vlgmr.msra.gmra.mrb[36].mxu0 %v943_v15  ;;  %v5918_v15 = vpack.c.bf16 %v321_v4, %v201_v3  ;;  %v5946_v4 = vpack.c.bf16 %v567_v63, %v447_v62 }
 0x191   :  { %5905 = vmatpush1.bf16.xpose.msra.mxu0 %v5904_v56  ;;  %3915 = vmatmul.mubr.f32.vlgmr.msra.gmra.mrb[36].mxu1 %v950_v19  ;;  %v200_v19 = vld [vmem:[#allocation6 + $0x280] sm:$0xff] }
 0x192   :  { %5913 = vmatpush1.bf16.xpose.msra.mxu1 %v5912_v57  ;;  %5907 = vmatprep.subr.bf16.mxu0 %v5906_v58  ;;  %v5920_v29 = vpack.c.bf16 %v320_v20, %v200_v19  ;;  %v324_v56 = vld [vmem:[#allocation6 + $0x660] sm:$0xff]  ;;  %v206_v57 = vld [vmem:[#allocation6 + $0x2b0] sm:$0xff]  ;;  %v331_v19 = vld [vmem:[#allocation6 + $0x698] sm:$0xff] }
 0x193   :  { %v2026_v1 = vpop.f32.mrb[10].mxu0  ;;  %5915 = vmatprep.subr.bf16.mxu1 %v5914_v59  ;;  %3984 = vmatprep.mubr.f32.mxu0 %v968_v60  ;;  %v326_v58 = vld [vmem:[#allocation6 + $0x670] sm:$0xff]  ;;  %v445_v59 = vld [vmem:[#allocation6 + $0xa28] sm:$0xff]  ;;  %v5958_v26 = vpack.c.bf16 %v331_v19, %v211_v18  ;;  %v572_v18 = vld [vmem:[#allocation6 + $0xe20] sm:$0xff] }
 0x194   :  { %v2027_v5 = vadd.f32 %v2026_v1, %v1957_v41  ;;  %v2028_v6 = vpop.f32.mrb[11].mxu0  ;;  %v2096_v7 = vpop.f32.mrb[10].mxu1  ;;  %4054 = vmatprep.mubr.f32.mxu1 %v969_v61  ;;  %v325_v41 = vld [vmem:[#allocation6 + $0x668] sm:$0xff]  ;;  %v994_v61 = vrot.slane %v111_v49, %v6374_v17  ;;  %v5944_v2 = vpack.c.bf16 %v326_v58, %v206_v57  ;;  %v454_v19 = vld [vmem:[#allocation6 + $0xa70] sm:$0xff] }
 0x195   :  { %v2098_v10 = vpop.f32.mrb[11].mxu1  ;;  %v565_v60 = vld [vmem:[#allocation6 + $0xde8] sm:$0xff]  ;;  %v1003_v6 = vcombine.high %v1001_v0, %v1001_v0 }
 0x196   :  { %v2097_v13 = vadd.f32 %v2096_v7, %v2027_v5  ;;  %v5938_v3 = vpack.c.bf16 %v565_v60, %v445_v59  ;;  %v1002_v5 = vcombine.high %v994_v61, %v994_v61  ;;  %v444_v7 = vld [vmem:[#allocation6 + $0xa20] sm:$0xff]  ;;  %v213_v49 = vld [vmem:[#allocation6 + $0x2e8] sm:$0xff] }
 0x197   :  { %v5940_v21 = vpack.c.bf16 %v564_v8, %v444_v7  ;;  %v113_v58 = vld [vmem:[#allocation3 + $0xb8] sm:$0xff]  ;;  %v455_v7 = vld [vmem:[#allocation6 + $0xa78] sm:$0xff] }
 0x198   :  { %v1021_v63 = vcombine.high %v113_v58, %v113_v58  ;;  %v575_v8 = vld [vmem:[#allocation6 + $0xe38] sm:$0xff] }
 0x199   :  { %5909 = vmatpush1.bf16.xpose.msra.mxu0 %v5908_v11  ;;  %v566_v11 = vld [vmem:[#allocation6 + $0xdf0] sm:$0xff] }
 0x19a   :  { %5917 = vmatpush1.bf16.xpose.msra.mxu1 %v5916_v14  ;;  %5919 = vmatprep.subr.bf16.mxu0 %v5918_v15  ;;  %v5948_v24 = vpack.c.bf16 %v566_v11, %v446_v9  ;;  %v1035_v9 = vrot.slane %v1021_v63, %v6374_v17  ;;  %v223_v63 = vld [vmem:[#allocation6 + $0x338] sm:$0xff] }
 0x19b   :  { %5927 = vmatprep.subr.bf16.mxu1 %v5926_v16 }
 0x1a0   :  { %3985 = vmatmul.mubr.f32.vlgmr.msra.gmra.mrb[38].mxu0 %v960_v52  ;;  %v5934_v52 = vpack.c.bf16 %v325_v41, %v205_v40  ;;  %v5962_v41 = vpack.c.bf16 %v571_v36, %v451_v35 }
 0x1a1   :  { %5921 = vmatpush1.bf16.xpose.msra.mxu0 %v5920_v29  ;;  %4055 = vmatmul.mubr.f32.vlgmr.msra.gmra.mrb[38].mxu1 %v967_v55  ;;  %v204_v55 = vld [vmem:[#allocation6 + $0x2a0] sm:$0xff] }
 0x1a2   :  { %5929 = vmatpush1.bf16.xpose.msra.mxu1 %v5928_v30  ;;  %5923 = vmatprep.subr.bf16.mxu0 %v5922_v31  ;;  %v5936_v1 = vpack.c.bf16 %v324_v56, %v204_v55  ;;  %v328_v29 = vld [vmem:[#allocation6 + $0x680] sm:$0xff]  ;;  %v210_v30 = vld [vmem:[#allocation6 + $0x2d0] sm:$0xff]  ;;  %v335_v55 = vld [vmem:[#allocation6 + $0x6b8] sm:$0xff] }
 0x1a3   :  { %v2166_v38 = vpop.f32.mrb[12].mxu0  ;;  %5931 = vmatprep.subr.bf16.mxu1 %v5930_v32  ;;  %4124 = vmatprep.mubr.f32.mxu0 %v985_v33  ;;  %v330_v31 = vld [vmem:[#allocation6 + $0x690] sm:$0xff]  ;;  %v449_v32 = vld [vmem:[#allocation6 + $0xa48] sm:$0xff]  ;;  %v5974_v62 = vpack.c.bf16 %v335_v55, %v215_v54  ;;  %v576_v54 = vld [vmem:[#allocation6 + $0xe40] sm:$0xff] }
 0x1a4   :  { %v2167_v42 = vadd.f32 %v2166_v38, %v2097_v13  ;;  %v2168_v43 = vpop.f32.mrb[13].mxu0  ;;  %v2236_v44 = vpop.f32.mrb[12].mxu1  ;;  %4194 = vmatprep.mubr.f32.mxu1 %v986_v34  ;;  %v329_v13 = vld [vmem:[#allocation6 + $0x688] sm:$0xff]  ;;  %v1011_v34 = vrot.slane %v112_v22, %v6374_v17  ;;  %v5960_v39 = vpack.c.bf16 %v330_v31, %v210_v30  ;;  %v114_v31 = vld [vmem:[#allocation3 + $0xc0] sm:$0xff] }
 0x1a5   :  { %v2238_v47 = vpop.f32.mrb[13].mxu1  ;;  %v569_v33 = vld [vmem:[#allocation6 + $0xe08] sm:$0xff]  ;;  %v1020_v43 = vcombine.high %v1018_v37, %v1018_v37  ;;  %v1038_v36 = vcombine.high %v114_v31, %v114_v31  ;;  %v458_v55 = vld [vmem:[#allocation6 + $0xa90] sm:$0xff] }
 0x1a6   :  { %v2237_v50 = vadd.f32 %v2236_v44, %v2167_v42  ;;  %v5954_v40 = vpack.c.bf16 %v569_v33, %v449_v32  ;;  %v1019_v42 = vcombine.high %v1011_v34, %v1011_v34  ;;  %v448_v44 = vld [vmem:[#allocation6 + $0xa40] sm:$0xff]  ;;  %v217_v22 = vld [vmem:[#allocation6 + $0x308] sm:$0xff] }
 0x1a7   :  { %v5956_v57 = vpack.c.bf16 %v568_v45, %v448_v44  ;;  %v459_v44 = vld [vmem:[#allocation6 + $0xa98] sm:$0xff] }
 0x1a8   :  { %v579_v45 = vld [vmem:[#allocation6 + $0xe58] sm:$0xff] }
 0x1a9   :  { %5925 = vmatpush1.bf16.xpose.msra.mxu0 %v5924_v48  ;;  %v570_v48 = vld [vmem:[#allocation6 + $0xe10] sm:$0xff] }
 0x1aa   :  { %5933 = vmatpush1.bf16.xpose.msra.mxu1 %v5932_v51  ;;  %5935 = vmatprep.subr.bf16.mxu0 %v5934_v52  ;;  %v5964_v60 = vpack.c.bf16 %v570_v48, %v450_v46  ;;  %v1052_v46 = vrot.slane %v1038_v36, %v6374_v17  ;;  %v227_v36 = vld [vmem:[#allocation6 + $0x358] sm:$0xff] }
 0x1ab   :  { %5943 = vmatprep.subr.bf16.mxu1 %v5942_v53 }
 0x1b0   :  { %4125 = vmatmul.mubr.f32.vlgmr.msra.gmra.mrb[40].mxu0 %v977_v25  ;;  %v5950_v25 = vpack.c.bf16 %v329_v13, %v209_v12  ;;  %v5978_v13 = vpack.c.bf16 %v575_v8, %v455_v7 }
 0x1b1   :  { %5937 = vmatpush1.bf16.xpose.msra.mxu0 %v5936_v1  ;;  %4195 = vmatmul.mubr.f32.vlgmr.msra.gmra.mrb[40].mxu1 %v984_v28  ;;  %v208_v28 = vld [vmem:[#allocation6 + $0x2c0] sm:$0xff] }
 0x1b2   :  { %5945 = vmatpush1.bf16.xpose.msra.mxu1 %v5944_v2  ;;  %5939 = vmatprep.subr.bf16.mxu0 %v5938_v3  ;;  %v5952_v38 = vpack.c.bf16 %v328_v29, %v208_v28  ;;  %v332_v1 = vld [vmem:[#allocation6 + $0x6a0] sm:$0xff]  ;;  %v214_v2 = vld [vmem:[#allocation6 + $0x2f0] sm:$0xff]  ;;  %v339_v28 = vld [vmem:[#allocation6 + $0x6d8] sm:$0xff] }
 0x1b3   :  { %v2306_v10 = vpop.f32.mrb[14].mxu0  ;;  %5947 = vmatprep.subr.bf16.mxu1 %v5946_v4  ;;  %4264 = vmatprep.mubr.f32.mxu0 %v1002_v5  ;;  %v334_v3 = vld [vmem:[#allocation6 + $0x6b0] sm:$0xff]  ;;  %v453_v4 = vld [vmem:[#allocation6 + $0xa68] sm:$0xff]  ;;  %v5990_v35 = vpack.c.bf16 %v339_v28, %v219_v27  ;;  %v580_v27 = vld [vmem:[#allocation6 + $0xe60] sm:$0xff] }
 0x1b4   :  { %v2307_v14 = vadd.f32 %v2306_v10, %v2237_v50  ;;  %v2308_v15 = vpop.f32.mrb[15].mxu0  ;;  %v2376_v16 = vpop.f32.mrb[14].mxu1  ;;  %4334 = vmatprep.mubr.f32.mxu1 %v1003_v6  ;;  %v333_v50 = vld [vmem:[#allocation6 + $0x6a8] sm:$0xff]  ;;  %v1028_v6 = vrot.slane %v113_v58, %v6374_v17  ;;  %v5976_v11 = vpack.c.bf16 %v334_v3, %v214_v2  ;;  %v115_v3 = vld [vmem:[#allocation3 + $0xc8] sm:$0xff]  ;;  %v462_v28 = vld [vmem:[#allocation6 + $0xab0] sm:$0xff] }
 0x1b5   :  { %v2378_v20 = vpop.f32.mrb[15].mxu1  ;;  %v573_v5 = vld [vmem:[#allocation6 + $0xe28] sm:$0xff]  ;;  %v1037_v15 = vcombine.high %v1035_v9, %v1035_v9  ;;  %v1055_v8 = vcombine.high %v115_v3, %v115_v3 }
 0x1b6   :  { %v2377_v23 = vadd.f32 %v2376_v16, %v2307_v14  ;;  %v5970_v12 = vpack.c.bf16 %v573_v5, %v453_v4  ;;  %v1036_v14 = vcombine.high %v1028_v6, %v1028_v6  ;;  %v452_v16 = vld [vmem:[#allocation6 + $0xa60] sm:$0xff]  ;;  %v221_v58 = vld [vmem:[#allocation6 + $0x328] sm:$0xff] }
 0x1b7   :  { %v5972_v30 = vpack.c.bf16 %v572_v18, %v452_v16  ;;  %v463_v16 = vld [vmem:[#allocation6 + $0xab8] sm:$0xff] }
 0x1b8   :  { %v583_v18 = vld [vmem:[#allocation6 + $0xe78] sm:$0xff] }
 0x1b9   :  { %5941 = vmatpush1.bf16.xpose.msra.mxu0 %v5940_v21  ;;  %v574_v21 = vld [vmem:[#allocation6 + $0xe30] sm:$0xff] }
 0x1ba   :  { %5949 = vmatpush1.bf16.xpose.msra.mxu1 %v5948_v24  ;;  %5951 = vmatprep.subr.bf16.mxu0 %v5950_v25  ;;  %v5980_v33 = vpack.c.bf16 %v574_v21, %v454_v19  ;;  %v1069_v19 = vrot.slane %v1055_v8, %v6374_v17  ;;  %v231_v8 = vld [vmem:[#allocation6 + $0x378] sm:$0xff] }
 0x1bb   :  { %5959 = vmatprep.subr.bf16.mxu1 %v5958_v26 }
 0x1c0   :  { %4265 = vmatmul.mubr.f32.vlgmr.msra.gmra.mrb[42].mxu0 %v994_v61  ;;  %v5966_v61 = vpack.c.bf16 %v333_v50, %v213_v49  ;;  %v5994_v50 = vpack.c.bf16 %v579_v45, %v459_v44 }
 0x1c1   :  { %5953 = vmatpush1.bf16.xpose.msra.mxu0 %v5952_v38  ;;  %4335 = vmatmul.mubr.f32.vlgmr.msra.gmra.mrb[42].mxu1 %v1001_v0  ;;  %v212_v0 = vld [vmem:[#allocation6 + $0x2e0] sm:$0xff] }
 0x1c2   :  { %5961 = vmatpush1.bf16.xpose.msra.mxu1 %v5960_v39  ;;  %5955 = vmatprep.subr.bf16.mxu0 %v5954_v40  ;;  %v5968_v10 = vpack.c.bf16 %v332_v1, %v212_v0  ;;  %v336_v38 = vld [vmem:[#allocation6 + $0x6c0] sm:$0xff]  ;;  %v218_v39 = vld [vmem:[#allocation6 + $0x310] sm:$0xff]  ;;  %v343_v0 = vld [vmem:[#allocation6 + $0x6f8] sm:$0xff] }
 0x1c3   :  { %v2446_v47 = vpop.f32.mrb[16].mxu0  ;;  %5963 = vmatprep.subr.bf16.mxu1 %v5962_v41  ;;  %4404 = vmatprep.mubr.f32.mxu0 %v1019_v42  ;;  %v338_v40 = vld [vmem:[#allocation6 + $0x6d0] sm:$0xff]  ;;  %v457_v41 = vld [vmem:[#allocation6 + $0xa88] sm:$0xff]  ;;  %v6006_v7 = vpack.c.bf16 %v343_v0, %v223_v63  ;;  %v584_v63 = vld [vmem:[#allocation6 + $0xe80] sm:$0xff] }
 0x1c4   :  { %v2447_v51 = vadd.f32 %v2446_v47, %v2377_v23  ;;  %v2448_v52 = vpop.f32.mrb[17].mxu0  ;;  %v2516_v53 = vpop.f32.mrb[16].mxu1  ;;  %4474 = vmatprep.mubr.f32.mxu1 %v1020_v43  ;;  %v337_v23 = vld [vmem:[#allocation6 + $0x6c8] sm:$0xff]  ;;  %v1045_v43 = vrot.slane %v114_v31, %v6374_v17  ;;  %v5992_v48 = vpack.c.bf16 %v338_v40, %v218_v39  ;;  %v116_v40 = vld [vmem:[#allocation3 + $0xd0] sm:$0xff]  ;;  %v466_v0 = vld [vmem:[#allocation6 + $0xad0] sm:$0xff] }
 0x1c5   :  { %v2518_v56 = vpop.f32.mrb[17].mxu1  ;;  %v577_v42 = vld [vmem:[#allocation6 + $0xe48] sm:$0xff]  ;;  %v1054_v52 = vcombine.high %v1052_v46, %v1052_v46  ;;  %v1072_v45 = vcombine.high %v116_v40, %v116_v40 }
 0x1c6   :  { %v2517_v59 = vadd.f32 %v2516_v53, %v2447_v51  ;;  %v5986_v49 = vpack.c.bf16 %v577_v42, %v457_v41  ;;  %v1053_v51 = vcombine.high %v1045_v43, %v1045_v43  ;;  %v456_v53 = vld [vmem:[#allocation6 + $0xa80] sm:$0xff]  ;;  %v225_v31 = vld [vmem:[#allocation6 + $0x348] sm:$0xff] }
 0x1c7   :  { %v5988_v2 = vpack.c.bf16 %v576_v54, %v456_v53  ;;  %v467_v53 = vld [vmem:[#allocation6 + $0xad8] sm:$0xff] }
 0x1c8   :  { %v587_v54 = vld [vmem:[#allocation6 + $0xe98] sm:$0xff] }
 0x1c9   :  { %5957 = vmatpush1.bf16.xpose.msra.mxu0 %v5956_v57  ;;  %v578_v57 = vld [vmem:[#allocation6 + $0xe50] sm:$0xff] }
 0x1ca   :  { %5965 = vmatpush1.bf16.xpose.msra.mxu1 %v5964_v60  ;;  %5967 = vmatprep.subr.bf16.mxu0 %v5966_v61  ;;  %v5996_v5 = vpack.c.bf16 %v578_v57, %v458_v55  ;;  %v1086_v55 = vrot.slane %v1072_v45, %v6374_v17  ;;  %v235_v45 = vld [vmem:[#allocation6 + $0x398] sm:$0xff] }
 0x1cb   :  { %5975 = vmatprep.subr.bf16.mxu1 %v5974_v62 }
 0x1d0   :  { %4405 = vmatmul.mubr.f32.vlgmr.msra.gmra.mrb[44].mxu0 %v1011_v34  ;;  %v5982_v34 = vpack.c.bf16 %v337_v23, %v217_v22  ;;  %v6010_v23 = vpack.c.bf16 %v583_v18, %v463_v16 }
 0x1d1   :  { %5969 = vmatpush1.bf16.xpose.msra.mxu0 %v5968_v10  ;;  %4475 = vmatmul.mubr.f32.vlgmr.msra.gmra.mrb[44].mxu1 %v1018_v37  ;;  %v216_v37 = vld [vmem:[#allocation6 + $0x300] sm:$0xff] }
 0x1d2   :  { %5977 = vmatpush1.bf16.xpose.msra.mxu1 %v5976_v11  ;;  %5971 = vmatprep.subr.bf16.mxu0 %v5970_v12  ;;  %v5984_v47 = vpack.c.bf16 %v336_v38, %v216_v37  ;;  %v340_v10 = vld [vmem:[#allocation6 + $0x6e0] sm:$0xff]  ;;  %v222_v11 = vld [vmem:[#allocation6 + $0x330] sm:$0xff]  ;;  %v347_v37 = vld [vmem:[#allocation6 + $0x718] sm:$0xff] }
 0x1d3   :  { %v2586_v20 = vpop.f32.mrb[18].mxu0  ;;  %5979 = vmatprep.subr.bf16.mxu1 %v5978_v13  ;;  %4544 = vmatprep.mubr.f32.mxu0 %v1036_v14  ;;  %v342_v12 = vld [vmem:[#allocation6 + $0x6f0] sm:$0xff]  ;;  %v461_v13 = vld [vmem:[#allocation6 + $0xaa8] sm:$0xff]  ;;  %v6022_v44 = vpack.c.bf16 %v347_v37, %v227_v36  ;;  %v588_v36 = vld [vmem:[#allocation6 + $0xea0] sm:$0xff] }
 0x1d4   :  { %v2587_v24 = vadd.f32 %v2586_v20, %v2517_v59  ;;  %v2588_v25 = vpop.f32.mrb[19].mxu0  ;;  %v2656_v26 = vpop.f32.mrb[18].mxu1  ;;  %4614 = vmatprep.mubr.f32.mxu1 %v1037_v15  ;;  %v341_v59 = vld [vmem:[#allocation6 + $0x6e8] sm:$0xff]  ;;  %v1062_v15 = vrot.slane %v115_v3, %v6374_v17  ;;  %v6008_v21 = vpack.c.bf16 %v342_v12, %v222_v11  ;;  %v470_v37 = vld [vmem:[#allocation6 + $0xaf0] sm:$0xff] }
 0x1d5   :  { %v2658_v29 = vpop.f32.mrb[19].mxu1  ;;  %v581_v14 = vld [vmem:[#allocation6 + $0xe68] sm:$0xff]  ;;  %v1071_v25 = vcombine.high %v1069_v19, %v1069_v19 }
 0x1d6   :  { %v2657_v32 = vadd.f32 %v2656_v26, %v2587_v24  ;;  %v6002_v22 = vpack.c.bf16 %v581_v14, %v461_v13  ;;  %v1070_v24 = vcombine.high %v1062_v15, %v1062_v15  ;;  %v460_v26 = vld [vmem:[#allocation6 + $0xaa0] sm:$0xff]  ;;  %v229_v3 = vld [vmem:[#allocation6 + $0x368] sm:$0xff] }
 0x1d7   :  { %v6004_v39 = vpack.c.bf16 %v580_v27, %v460_v26  ;;  %v117_v12 = vld [vmem:[#allocation3 + $0xd8] sm:$0xff]  ;;  %v471_v26 = vld [vmem:[#allocation6 + $0xaf8] sm:$0xff] }
 0x1d8   :  { %v1089_v18 = vcombine.high %v117_v12, %v117_v12  ;;  %v591_v27 = vld [vmem:[#allocation6 + $0xeb8] sm:$0xff] }
 0x1d9   :  { %5973 = vmatpush1.bf16.xpose.msra.mxu0 %v5972_v30  ;;  %v582_v30 = vld [vmem:[#allocation6 + $0xe70] sm:$0xff] }
 0x1da   :  { %5981 = vmatpush1.bf16.xpose.msra.mxu1 %v5980_v33  ;;  %5983 = vmatprep.subr.bf16.mxu0 %v5982_v34  ;;  %v6012_v42 = vpack.c.bf16 %v582_v30, %v462_v28  ;;  %v1103_v28 = vrot.slane %v1089_v18, %v6374_v17  ;;  %v239_v18 = vld [vmem:[#allocation6 + $0x3b8] sm:$0xff] }
 0x1db   :  { %5991 = vmatprep.subr.bf16.mxu1 %v5990_v35 }
 0x1e0   :  { %4545 = vmatmul.mubr.f32.vlgmr.msra.gmra.mrb[46].mxu0 %v1028_v6  ;;  %v5998_v6 = vpack.c.bf16 %v341_v59, %v221_v58  ;;  %v6026_v59 = vpack.c.bf16 %v587_v54, %v467_v53 }
 0x1e1   :  { %5985 = vmatpush1.bf16.xpose.msra.mxu0 %v5984_v47  ;;  %4615 = vmatmul.mubr.f32.vlgmr.msra.gmra.mrb[46].mxu1 %v1035_v9  ;;  %v220_v9 = vld [vmem:[#allocation6 + $0x320] sm:$0xff] }
 0x1e2   :  { %5993 = vmatpush1.bf16.xpose.msra.mxu1 %v5992_v48  ;;  %5987 = vmatprep.subr.bf16.mxu0 %v5986_v49  ;;  %v6000_v20 = vpack.c.bf16 %v340_v10, %v220_v9  ;;  %v344_v47 = vld [vmem:[#allocation6 + $0x700] sm:$0xff]  ;;  %v226_v48 = vld [vmem:[#allocation6 + $0x350] sm:$0xff]  ;;  %v351_v9 = vld [vmem:[#allocation6 + $0x738] sm:$0xff] }
 0x1e3   :  { %v2726_v56 = vpop.f32.mrb[20].mxu0  ;;  %5995 = vmatprep.subr.bf16.mxu1 %v5994_v50  ;;  %4684 = vmatprep.mubr.f32.mxu0 %v1053_v51  ;;  %v346_v49 = vld [vmem:[#allocation6 + $0x710] sm:$0xff]  ;;  %v465_v50 = vld [vmem:[#allocation6 + $0xac8] sm:$0xff]  ;;  %v6038_v16 = vpack.c.bf16 %v351_v9, %v231_v8  ;;  %v592_v8 = vld [vmem:[#allocation6 + $0xec0] sm:$0xff] }
 0x1e4   :  { %v2727_v60 = vadd.f32 %v2726_v56, %v2657_v32  ;;  %v2728_v61 = vpop.f32.mrb[21].mxu0  ;;  %v2796_v62 = vpop.f32.mrb[20].mxu1  ;;  %4754 = vmatprep.mubr.f32.mxu1 %v1054_v52  ;;  %v345_v32 = vld [vmem:[#allocation6 + $0x708] sm:$0xff]  ;;  %v1079_v52 = vrot.slane %v116_v40, %v6374_v17  ;;  %v6024_v57 = vpack.c.bf16 %v346_v49, %v226_v48  ;;  %v118_v49 = vld [vmem:[#allocation3 + $0xe0] sm:$0xff] }
 0x1e5   :  { %v2798_v1 = vpop.f32.mrb[21].mxu1  ;;  %v585_v51 = vld [vmem:[#allocation6 + $0xe88] sm:$0xff]  ;;  %v1088_v61 = vcombine.high %v1086_v55, %v1086_v55  ;;  %v1106_v54 = vcombine.high %v118_v49, %v118_v49  ;;  %v474_v9 = vld [vmem:[#allocation6 + $0xb10] sm:$0xff] }
 0x1e6   :  { %v2797_v4 = vadd.f32 %v2796_v62, %v2727_v60  ;;  %v6018_v58 = vpack.c.bf16 %v585_v51, %v465_v50  ;;  %v1087_v60 = vcombine.high %v1079_v52, %v1079_v52  ;;  %v464_v62 = vld [vmem:[#allocation6 + $0xac0] sm:$0xff]  ;;  %v233_v40 = vld [vmem:[#allocation6 + $0x388] sm:$0xff] }
 0x1e7   :  { %v6020_v11 = vpack.c.bf16 %v584_v63, %v464_v62  ;;  %v475_v62 = vld [vmem:[#allocation6 + $0xb18] sm:$0xff] }
 0x1e8   :  { %v595_v63 = vld [vmem:[#allocation6 + $0xed8] sm:$0xff] }
 0x1e9   :  { %5989 = vmatpush1.bf16.xpose.msra.mxu0 %v5988_v2  ;;  %v586_v2 = vld [vmem:[#allocation6 + $0xe90] sm:$0xff] }
 0x1ea   :  { %5997 = vmatpush1.bf16.xpose.msra.mxu1 %v5996_v5  ;;  %5999 = vmatprep.subr.bf16.mxu0 %v5998_v6  ;;  %v6028_v14 = vpack.c.bf16 %v586_v2, %v466_v0  ;;  %v1120_v0 = vrot.slane %v1106_v54, %v6374_v17 }
 0x1eb   :  { %6007 = vmatprep.subr.bf16.mxu1 %v6006_v7 }
 0x1f0   :  { %4685 = vmatmul.mubr.f32.vlgmr.msra.gmra.mrb[48].mxu0 %v1045_v43  ;;  %v6014_v43 = vpack.c.bf16 %v345_v32, %v225_v31  ;;  %v6042_v32 = vpack.c.bf16 %v591_v27, %v471_v26 }
 0x1f1   :  { %6001 = vmatpush1.bf16.xpose.msra.mxu0 %v6000_v20  ;;  %4755 = vmatmul.mubr.f32.vlgmr.msra.gmra.mrb[48].mxu1 %v1052_v46  ;;  %v224_v46 = vld [vmem:[#allocation6 + $0x340] sm:$0xff] }
 0x1f2   :  { %6009 = vmatpush1.bf16.xpose.msra.mxu1 %v6008_v21  ;;  %6003 = vmatprep.subr.bf16.mxu0 %v6002_v22  ;;  %v6016_v56 = vpack.c.bf16 %v344_v47, %v224_v46  ;;  %v348_v20 = vld [vmem:[#allocation6 + $0x720] sm:$0xff]  ;;  %v230_v21 = vld [vmem:[#allocation6 + $0x370] sm:$0xff]  ;;  %v355_v46 = vld [vmem:[#allocation6 + $0x758] sm:$0xff] }
 0x1f3   :  { %v2866_v29 = vpop.f32.mrb[22].mxu0  ;;  %6011 = vmatprep.subr.bf16.mxu1 %v6010_v23  ;;  %4824 = vmatprep.mubr.f32.mxu0 %v1070_v24  ;;  %v350_v22 = vld [vmem:[#allocation6 + $0x730] sm:$0xff]  ;;  %v469_v23 = vld [vmem:[#allocation6 + $0xae8] sm:$0xff]  ;;  %v6054_v53 = vpack.c.bf16 %v355_v46, %v235_v45  ;;  %v596_v45 = vld [vmem:[#allocation6 + $0xee0] sm:$0xff] }
 0x1f4   :  { %v2867_v33 = vadd.f32 %v2866_v29, %v2797_v4  ;;  %v2868_v34 = vpop.f32.mrb[23].mxu0  ;;  %v2936_v35 = vpop.f32.mrb[22].mxu1  ;;  %4894 = vmatprep.mubr.f32.mxu1 %v1071_v25  ;;  %v349_v4 = vld [vmem:[#allocation6 + $0x728] sm:$0xff]  ;;  %v1096_v25 = vrot.slane %v117_v12, %v6374_v17  ;;  %v6040_v30 = vpack.c.bf16 %v350_v22, %v230_v21  ;;  %v119_v22 = vld [vmem:[#allocation3 + $0xe8] sm:$0xff] }
 0x1f5   :  { %v2938_v38 = vpop.f32.mrb[23].mxu1  ;;  %v589_v24 = vld [vmem:[#allocation6 + $0xea8] sm:$0xff]  ;;  %v1105_v34 = vcombine.high %v1103_v28, %v1103_v28  ;;  %v1123_v27 = vcombine.high %v119_v22, %v119_v22 }
 0x1f6   :  { %v2937_v41 = vadd.f32 %v2936_v35, %v2867_v33  ;;  %v6034_v31 = vpack.c.bf16 %v589_v24, %v469_v23  ;;  %v1104_v33 = vcombine.high %v1096_v25, %v1096_v25  ;;  %v468_v35 = vld [vmem:[#allocation6 + $0xae0] sm:$0xff]  ;;  %v237_v12 = vld [vmem:[#allocation6 + $0x3a8] sm:$0xff] }
 0x1f7   :  { %v6036_v48 = vpack.c.bf16 %v588_v36, %v468_v35  ;;  %v479_v35 = vld [vmem:[#allocation6 + $0xb38] sm:$0xff] }
 0x1f8   :  { %v599_v36 = vld [vmem:[#allocation6 + $0xef8] sm:$0xff] }
 0x1f9   :  { %6005 = vmatpush1.bf16.xpose.msra.mxu0 %v6004_v39  ;;  %v590_v39 = vld [vmem:[#allocation6 + $0xeb0] sm:$0xff] }
 0x1fa   :  { %6013 = vmatpush1.bf16.xpose.msra.mxu1 %v6012_v42  ;;  %6015 = vmatprep.subr.bf16.mxu0 %v6014_v43  ;;  %v6044_v51 = vpack.c.bf16 %v590_v39, %v470_v37  ;;  %v1137_v37 = vrot.slane %v1123_v27, %v6374_v17 }
 0x1fb   :  { %6023 = vmatprep.subr.bf16.mxu1 %v6022_v44 }
 0x200   :  { %4825 = vmatmul.mubr.f32.vlgmr.msra.gmra.mrb[50].mxu0 %v1062_v15  ;;  %v6030_v15 = vpack.c.bf16 %v349_v4, %v229_v3  ;;  %v6058_v4 = vpack.c.bf16 %v595_v63, %v475_v62 }
 0x201   :  { %6017 = vmatpush1.bf16.xpose.msra.mxu0 %v6016_v56  ;;  %4895 = vmatmul.mubr.f32.vlgmr.msra.gmra.mrb[50].mxu1 %v1069_v19  ;;  %v228_v19 = vld [vmem:[#allocation6 + $0x360] sm:$0xff] }
 0x202   :  { %6025 = vmatpush1.bf16.xpose.msra.mxu1 %v6024_v57  ;;  %6019 = vmatprep.subr.bf16.mxu0 %v6018_v58  ;;  %v6032_v29 = vpack.c.bf16 %v348_v20, %v228_v19  ;;  %v352_v56 = vld [vmem:[#allocation6 + $0x740] sm:$0xff]  ;;  %v234_v57 = vld [vmem:[#allocation6 + $0x390] sm:$0xff]  ;;  %v359_v19 = vld [vmem:[#allocation6 + $0x778] sm:$0xff] }
 0x203   :  { %v3006_v1 = vpop.f32.mrb[24].mxu0  ;;  %6027 = vmatprep.subr.bf16.mxu1 %v6026_v59  ;;  %4964 = vmatprep.mubr.f32.mxu0 %v1087_v60  ;;  %v354_v58 = vld [vmem:[#allocation6 + $0x750] sm:$0xff]  ;;  %v473_v59 = vld [vmem:[#allocation6 + $0xb08] sm:$0xff]  ;;  %v6070_v26 = vpack.c.bf16 %v359_v19, %v239_v18 }
 0x204   :  { %v3007_v5 = vadd.f32 %v3006_v1, %v2937_v41  ;;  %v3008_v6 = vpop.f32.mrb[25].mxu0  ;;  %v3076_v7 = vpop.f32.mrb[24].mxu1  ;;  %5034 = vmatprep.mubr.f32.mxu1 %v1088_v61  ;;  %v353_v41 = vld [vmem:[#allocation6 + $0x748] sm:$0xff]  ;;  %v1113_v61 = vrot.slane %v118_v49, %v6374_v17  ;;  %v6056_v2 = vpack.c.bf16 %v354_v58, %v234_v57 }
 0x205   :  { %v3078_v10 = vpop.f32.mrb[25].mxu1  ;;  %v593_v60 = vld [vmem:[#allocation6 + $0xec8] sm:$0xff]  ;;  %v1122_v6 = vcombine.high %v1120_v0, %v1120_v0 }
 0x206   :  { %v3077_v13 = vadd.f32 %v3076_v7, %v3007_v5  ;;  %v6050_v3 = vpack.c.bf16 %v593_v60, %v473_v59  ;;  %v1121_v5 = vcombine.high %v1113_v61, %v1113_v61  ;;  %v472_v7 = vld [vmem:[#allocation6 + $0xb00] sm:$0xff] }
 0x207   :  { %v6052_v21 = vpack.c.bf16 %v592_v8, %v472_v7 }
 0x209   :  { %6021 = vmatpush1.bf16.xpose.msra.mxu0 %v6020_v11  ;;  %v594_v11 = vld [vmem:[#allocation6 + $0xed0] sm:$0xff] }
 0x20a   :  { %6029 = vmatpush1.bf16.xpose.msra.mxu1 %v6028_v14  ;;  %6031 = vmatprep.subr.bf16.mxu0 %v6030_v15  ;;  %v6060_v24 = vpack.c.bf16 %v594_v11, %v474_v9 }
 0x20b   :  { %6039 = vmatprep.subr.bf16.mxu1 %v6038_v16 }
 0x210   :  { %4965 = vmatmul.mubr.f32.vlgmr.msra.gmra.mrb[52].mxu0 %v1079_v52  ;;  %v6046_v52 = vpack.c.bf16 %v353_v41, %v233_v40  ;;  %v6074_v41 = vpack.c.bf16 %v599_v36, %v479_v35  ;;  %v5478_v35 = vld [vmem:[#allocation9 + $0x10] sm:$0xff] }
 0x211   :  { %6033 = vmatpush1.bf16.xpose.msra.mxu0 %v6032_v29  ;;  %5035 = vmatmul.mubr.f32.vlgmr.msra.gmra.mrb[52].mxu1 %v1086_v55  ;;  %v232_v55 = vld [vmem:[#allocation6 + $0x380] sm:$0xff] }
 0x212   :  { %6041 = vmatpush1.bf16.xpose.msra.mxu1 %v6040_v30  ;;  %6035 = vmatprep.subr.bf16.mxu0 %v6034_v31  ;;  %v6048_v1 = vpack.c.bf16 %v352_v56, %v232_v55  ;;  %v356_v29 = vld [vmem:[#allocation6 + $0x760] sm:$0xff]  ;;  %v238_v30 = vld [vmem:[#allocation6 + $0x3b0] sm:$0xff] }
 0x213   :  { %v3146_v38 = vpop.f32.mrb[26].mxu0  ;;  %6043 = vmatprep.subr.bf16.mxu1 %v6042_v32  ;;  %5104 = vmatprep.mubr.f32.mxu0 %v1104_v33  ;;  %v358_v31 = vld [vmem:[#allocation6 + $0x770] sm:$0xff]  ;;  %v477_v32 = vld [vmem:[#allocation6 + $0xb28] sm:$0xff] }
 0x214   :  { %v3147_v42 = vadd.f32 %v3146_v38, %v3077_v13  ;;  %v3148_v43 = vpop.f32.mrb[27].mxu0  ;;  %v3216_v44 = vpop.f32.mrb[26].mxu1  ;;  %5174 = vmatprep.mubr.f32.mxu1 %v1105_v34  ;;  %v357_v13 = vld [vmem:[#allocation6 + $0x768] sm:$0xff]  ;;  %v1130_v34 = vrot.slane %v119_v22, %v6374_v17  ;;  %v6072_v39 = vpack.c.bf16 %v358_v31, %v238_v30  ;;  %v6280_v22 = vmov 0.0  }
 0x215   :  { %v3218_v47 = vpop.f32.mrb[27].mxu1  ;;  %v597_v33 = vld [vmem:[#allocation6 + $0xee8] sm:$0xff]  ;;  %v1139_v43 = vcombine.high %v1137_v37, %v1137_v37  ;;  %88 = vst.msk [vmem:[#allocation2] sm:$0x3] %vm87_vm0, %v6280_v22 }
 0x216   :  { %v3217_v50 = vadd.f32 %v3216_v44, %v3147_v42  ;;  %v6066_v40 = vpack.c.bf16 %v597_v33, %v477_v32  ;;  %v1138_v42 = vcombine.high %v1130_v34, %v1130_v34  ;;  %v476_v44 = vld [vmem:[#allocation6 + $0xb20] sm:$0xff]  ;;  %v478_v47 = vld [vmem:[#allocation6 + $0xb30] sm:$0xff] }
 0x217   :  { %v5476_v33 = vld [vmem:[#allocation9] sm:$0xff] }
 0x219   :  { %6037 = vmatpush1.bf16.xpose.msra.mxu0 %v6036_v48  ;;  %v598_v48 = vld [vmem:[#allocation6 + $0xef0] sm:$0xff] }
 0x21a   :  { %6045 = vmatpush1.bf16.xpose.msra.mxu1 %v6044_v51  ;;  %6047 = vmatprep.subr.bf16.mxu0 %v6046_v52  ;;  %v6068_v52 = vpack.c.bf16 %v596_v45, %v476_v44  ;;  %v6076_v54 = vpack.c.bf16 %v598_v48, %v478_v47 }
 0x21b   :  { %6055 = vmatprep.subr.bf16.mxu1 %v6054_v53 }
 0x220   :  { %5105 = vmatmul.mubr.f32.vlgmr.msra.gmra.mrb[54].mxu0 %v1096_v25  ;;  %v6062_v25 = vpack.c.bf16 %v357_v13, %v237_v12 }
 0x221   :  { %6049 = vmatpush1.bf16.xpose.msra.mxu0 %v6048_v1  ;;  %5175 = vmatmul.mubr.f32.vlgmr.msra.gmra.mrb[54].mxu1 %v1103_v28  ;;  %v236_v28 = vld [vmem:[#allocation6 + $0x3a0] sm:$0xff] }
 0x222   :  { %6057 = vmatpush1.bf16.xpose.msra.mxu1 %v6056_v2  ;;  %6051 = vmatprep.subr.bf16.mxu0 %v6050_v3  ;;  %v6064_v38 = vpack.c.bf16 %v356_v29, %v236_v28 }
 0x223   :  { %v3286_v10 = vpop.f32.mrb[28].mxu0  ;;  %6059 = vmatprep.subr.bf16.mxu1 %v6058_v4  ;;  %5244 = vmatprep.mubr.f32.mxu0 %v1121_v5 }
 0x224   :  { %v3287_v14 = vadd.f32 %v3286_v10, %v3217_v50  ;;  %v3288_v15 = vpop.f32.mrb[29].mxu0  ;;  %v3356_v16 = vpop.f32.mrb[28].mxu1  ;;  %5314 = vmatprep.mubr.f32.mxu1 %v1122_v6 }
 0x225   :  { %v3358_v20 = vpop.f32.mrb[29].mxu1 }
 0x226   :  { %v3357_v23 = vadd.f32 %v3356_v16, %v3287_v14 }
 0x229   :  { %6053 = vmatpush1.bf16.xpose.msra.mxu0 %v6052_v21 }
 0x22a   :  { %6061 = vmatpush1.bf16.xpose.msra.mxu1 %v6060_v24  ;;  %6063 = vmatprep.subr.bf16.mxu0 %v6062_v25 }
 0x22b   :  { %6071 = vmatprep.subr.bf16.mxu1 %v6070_v26 }
 0x230   :  { %5245 = vmatmul.mubr.f32.vlgmr.msra.gmra.mrb[56].mxu0 %v1113_v61 }
 0x231   :  { %6065 = vmatpush1.bf16.xpose.msra.mxu0 %v6064_v38  ;;  %5315 = vmatmul.mubr.f32.vlgmr.msra.gmra.mrb[56].mxu1 %v1120_v0 }
 0x232   :  { %6073 = vmatpush1.bf16.xpose.msra.mxu1 %v6072_v39  ;;  %6067 = vmatprep.subr.bf16.mxu0 %v6066_v40  ;;  %v5479_v39 = vld [vmem:[#allocation9 + $0x18] sm:$0xff] }
 0x233   :  { %v3426_v46 = vpop.f32.mrb[30].mxu0  ;;  %6075 = vmatprep.subr.bf16.mxu1 %v6074_v41  ;;  %5384 = vmatprep.mubr.f32.mxu0 %v1138_v42  ;;  %v6082_v41 = vpack.c.bf16 %v5479_v39, %v5478_v35 }
 0x234   :  { %v3427_v49 = vadd.f32 %v3426_v46, %v3357_v23  ;;  %v3428_v17 = vpop.f32.mrb[31].mxu0  ;;  %v3496_v50 = vpop.f32.mrb[30].mxu1  ;;  %5454 = vmatprep.mubr.f32.mxu1 %v1139_v43 }
 0x235   :  { %v3498_v51 = vpop.f32.mrb[31].mxu1 }
 0x236   :  { %v3497_v53 = vadd.f32 %v3496_v50, %v3427_v49 }
 0x239   :  { %6069 = vmatpush1.bf16.xpose.msra.mxu0 %v6068_v52 }
 0x23a   :  { %6077 = vmatpush1.bf16.xpose.msra.mxu1 %v6076_v54 }
 0x240   :  { %5385 = vmatmul.mubr.f32.vlgmr.msra.gmra.mrb[58].mxu0 %v1130_v34  ;;  %v5477_v34 = vld [vmem:[#allocation9 + $0x8] sm:$0xff] }
 0x241   :  { %5455 = vmatmul.mubr.f32.vlgmr.msra.gmra.mrb[58].mxu1 %v1137_v37  ;;  %v6281_v37 = vmov 0.0|0.0   ;;  %v6079_v38 = vpack.c.bf16 %v5477_v34, %v5476_v33  ;;  %5595 = vmatprep.mubr.msk.f32.mxu0 %vm6282_vm1, %v6280_v22  ;;  %v5579_v22 = vld [vmem:[#allocation8] ss:$0 sm:$0xff] }
 0x242   :  { %6078 = vmatprep.subr.bf16.mxu0 %v6281_v37 }
 0x243   :  { %v3566_v55 = vpop.f32.mrb[32].mxu0  ;;  %6080 = vmatpush3.bf16.msra.mxu0 %v6079_v38 }
 0x244   :  { %v3567_v56 = vadd.f32 %v3566_v55, %v3497_v53  ;;  %v3568_v57 = vpop.f32.mrb[33].mxu0  ;;  %v3636_v58 = vpop.f32.mrb[32].mxu1  ;;  %6081 = vmatprep.subr.bf16.mxu0 %v6281_v37 }
 0x245   :  { %v3638_v59 = vpop.f32.mrb[33].mxu1 }
 0x246   :  { %v3637_v60 = vadd.f32 %v3636_v58, %v3567_v56 }
 0x247   :  { %6083 = vmatpush3.bf16.msra.mxu0 %v6082_v41 }
 0x253   :  { %v3706_v61 = vpop.f32.mrb[34].mxu0 }
 0x254   :  { %v3707_v62 = vadd.f32 %v3706_v61, %v3637_v60  ;;  %v3708_v63 = vpop.f32.mrb[35].mxu0  ;;  %v3776_v0 = vpop.f32.mrb[34].mxu1 }
 0x255   :  { %v3778_v1 = vpop.f32.mrb[35].mxu1 }
 0x256   :  { %v3777_v2 = vadd.f32 %v3776_v0, %v3707_v62 }
 0x263   :  { %v3846_v3 = vpop.f32.mrb[36].mxu0 }
 0x264   :  { %v3847_v4 = vadd.f32 %v3846_v3, %v3777_v2  ;;  %v3848_v5 = vpop.f32.mrb[37].mxu0  ;;  %v3916_v6 = vpop.f32.mrb[36].mxu1 }
 0x265   :  { %v3918_v7 = vpop.f32.mrb[37].mxu1 }
 0x266   :  { %v3917_v8 = vadd.f32 %v3916_v6, %v3847_v4 }
 0x273   :  { %v3986_v9 = vpop.f32.mrb[38].mxu0 }
 0x274   :  { %v3987_v10 = vadd.f32 %v3986_v9, %v3917_v8  ;;  %v3988_v11 = vpop.f32.mrb[39].mxu0  ;;  %v4056_v12 = vpop.f32.mrb[38].mxu1 }
 0x275   :  { %v4058_v13 = vpop.f32.mrb[39].mxu1 }
 0x276   :  { %v4057_v14 = vadd.f32 %v4056_v12, %v3987_v10 }
 0x283   :  { %v4126_v15 = vpop.f32.mrb[40].mxu0 }
 0x284   :  { %v4127_v16 = vadd.f32 %v4126_v15, %v4057_v14  ;;  %v4128_v18 = vpop.f32.mrb[41].mxu0  ;;  %v4196_v19 = vpop.f32.mrb[40].mxu1 }
 0x285   :  { %v4198_v20 = vpop.f32.mrb[41].mxu1  ;;  %v89_v18 = vld [vmem:[#allocation2] sm:$0x3] }
 0x286   :  { %v4197_v21 = vadd.f32 %v4196_v19, %v4127_v16 }
 0x293   :  { %v4266_v23 = vpop.f32.mrb[42].mxu0 }
 0x294   :  { %v4267_v24 = vadd.f32 %v4266_v23, %v4197_v21  ;;  %v4268_v25 = vpop.f32.mrb[43].mxu0  ;;  %v4336_v26 = vpop.f32.mrb[42].mxu1 }
 0x295   :  { %v4338_v27 = vpop.f32.mrb[43].mxu1 }
 0x296   :  { %v4337_v28 = vadd.f32 %v4336_v26, %v4267_v24  ;;  %v5580_v26 = vld [vmem:[#allocation11] ss:$0 sm:$0xff] }
 0x2a3   :  { %v4406_v29 = vpop.f32.mrb[44].mxu0 }
 0x2a4   :  { %v4407_v30 = vadd.f32 %v4406_v29, %v4337_v28  ;;  %v4408_v31 = vpop.f32.mrb[45].mxu0  ;;  %v4476_v32 = vpop.f32.mrb[44].mxu1 }
 0x2a5   :  { %v4478_v36 = vpop.f32.mrb[45].mxu1 }
 0x2a6   :  { %v4477_v40 = vadd.f32 %v4476_v32, %v4407_v30 }
 0x2b3   :  { %v4546_v42 = vpop.f32.mrb[46].mxu0 }
 0x2b4   :  { %v4547_v43 = vadd.f32 %v4546_v42, %v4477_v40  ;;  %v4548_v44 = vpop.f32.mrb[47].mxu0  ;;  %v4616_v45 = vpop.f32.mrb[46].mxu1 }
 0x2b5   :  { %v4618_v46 = vpop.f32.mrb[47].mxu1 }
 0x2b6   :  { %v4617_v47 = vadd.f32 %v4616_v45, %v4547_v43 }
 0x2c3   :  { %v4686_v48 = vpop.f32.mrb[48].mxu0 }
 0x2c4   :  { %v4687_v49 = vadd.f32 %v4686_v48, %v4617_v47  ;;  %v4688_v17 = vpop.f32.mrb[49].mxu0  ;;  %v4756_v50 = vpop.f32.mrb[48].mxu1 }
 0x2c5   :  { %v4758_v51 = vpop.f32.mrb[49].mxu1 }
 0x2c6   :  { %v4757_v52 = vadd.f32 %v4756_v50, %v4687_v49 }
 0x2d3   :  { %v4826_v53 = vpop.f32.mrb[50].mxu0 }
 0x2d4   :  { %v4827_v54 = vadd.f32 %v4826_v53, %v4757_v52  ;;  %v4828_v55 = vpop.f32.mrb[51].mxu0  ;;  %v4896_v56 = vpop.f32.mrb[50].mxu1 }
 0x2d5   :  { %v4898_v57 = vpop.f32.mrb[51].mxu1 }
 0x2d6   :  { %v4897_v58 = vadd.f32 %v4896_v56, %v4827_v54 }
 0x2e3   :  { %v4966_v59 = vpop.f32.mrb[52].mxu0 }
 0x2e4   :  { %v4967_v60 = vadd.f32 %v4966_v59, %v4897_v58  ;;  %v4968_v61 = vpop.f32.mrb[53].mxu0  ;;  %v5036_v62 = vpop.f32.mrb[52].mxu1 }
 0x2e5   :  { %v5038_v63 = vpop.f32.mrb[53].mxu1 }
 0x2e6   :  { %v5037_v0 = vadd.f32 %v5036_v62, %v4967_v60 }
 0x2f3   :  { %v5106_v1 = vpop.f32.mrb[54].mxu0 }
 0x2f4   :  { %v5107_v2 = vadd.f32 %v5106_v1, %v5037_v0  ;;  %v5108_v3 = vpop.f32.mrb[55].mxu0  ;;  %v5176_v4 = vpop.f32.mrb[54].mxu1 }
 0x2f5   :  { %v5178_v5 = vpop.f32.mrb[55].mxu1 }
 0x2f6   :  { %v5177_v6 = vadd.f32 %v5176_v4, %v5107_v2 }
 0x303   :  { %v5246_v7 = vpop.f32.mrb[56].mxu0 }
 0x304   :  { %v5247_v8 = vadd.f32 %v5246_v7, %v5177_v6  ;;  %v5248_v9 = vpop.f32.mrb[57].mxu0  ;;  %v5316_v10 = vpop.f32.mrb[56].mxu1 }
 0x305   :  { %v5318_v11 = vpop.f32.mrb[57].mxu1 }
 0x306   :  { %v5317_v12 = vadd.f32 %v5316_v10, %v5247_v8 }
 0x313   :  { %v5386_v13 = vpop.f32.mrb[58].mxu0 }
 0x314   :  { %v5387_v14 = vadd.f32 %v5386_v13, %v5317_v12  ;;  %v5388_v15 = vpop.f32.mrb[59].mxu0  ;;  %v5456_v16 = vpop.f32.mrb[58].mxu1 }
 0x315   :  { %v5458_v19 = vpop.f32.mrb[59].mxu1 }
 0x316   :  { %v5457_v20 = vadd.f32 %v5456_v16, %v5387_v14 }
 0x318   :  { %v5460_v21 = vadd.f32 %v5457_v20, %v89_v18 }
 0x31a   :  { %5462 = vst.msk [vmem:[#allocation2] sm:$0x3] %vm87_vm0, %v5460_v21 }
 0x321   :  { %v5466_v23 = vld [vmem:[#allocation2] sm:$0x3] }
 0x322   :  { %v5474_v24 = vadd.f32 %v5579_v22, %v5466_v23 }
 0x324   :  { %6128 = vtanh.f32 %v5474_v24 }
 0x32e   :  { %v6129_v25 = vpop.eup %6128 }
 0x32f   :  { %5596 = vmatmul.mubr.msk.f32.vlgmr.msra.gmra.mrb[60].mxu0 %vm5487_vm2, %v6129_v25 }
 0x402   :  { %v5557_v27 = vpop.f32.mrb[60].mxu0 }
 0x403   :  { %v5558_v28 = vadd.f32 %v5580_v26, %v5557_v27  ;;  %v5597_v29 = vpop.f32.mrb[61].mxu0 }
 0x405   :  { %5561 = vst [vmem:[#allocation12] sm:$0x3] %v5558_v28 }
 0x406   :  { %6251 = shalt.err (!%p6248_p2)
}
 0x407   :  { %s6252_s7 = scalar_lea.hbm %s6455_s5, 32 }
 0x408   :  { %p6253_p3 = scmp.ne.s32.totalorder %s6455_s5, %s6252_s7  ;;  %p6256_p4 = scmp.lt.u32.totalorder %s6252_s7, %s6455_s5 }
 0x40a   :  { %p6258_p5 = pnand %p6256_p4, %p6253_p3 }
 0x40c   :  { %6261 = shalt.err (!%p6258_p5)
}
 0x40d   :  { %5571 = dma.vmem_to_hbm [thread:$0]  %s5569_s29, 32, %s6455_s5, [#allocation5]  }
 0x40e   :  { %6268 = dma.done.wait [#allocation5], 32  }
 0x40f   :  { %6269 = vsyncadd [#allocation5], 4294967264 }
 0x410   :  { %5575 = vsyncpa [#allocation4], 1 }
 0x411   :  { %5576 = vsyncpa [#allocation7], 1 }
 0x412   :  { %5577 = vsyncpa [#allocation10], 1 }
 0x413   :  { %5578 = vsyncpa [#allocation5], 1 }

</bundles_post_ra>
